<compile_context>
chip_gen: v7x
topology: tpu7x:2x2x1
jax: 0.10.0
libtpu: 0.0.40
codegen_flags: <defaults>
</compile_context>

<pallas_src>
import math

import jax
import jax.numpy as jnp
import numpy as np
from jax import lax
from jax.experimental import pallas as pl
from jax.experimental.pallas import tpu as pltpu

# ----------------------------- config (small) -----------------------------
BATCH = 2
SEQ = 8
HIDDEN = 32
NUM_HEADS = 4
HEAD_DIM = HIDDEN // NUM_HEADS
INTERMEDIATE = 4 * HIDDEN          # 128 == lane width, convenient for the slab
VOCAB = 64
MAX_POS = 16
NUM_LABELS = 1
OUT_LANES = 128                    # lane-dense output width
LN_EPS = 1e-12


def _fs(shape):
    """Whole-array block for grid=(1,)."""
    return pl.BlockSpec(shape, lambda i: (0,) * len(shape))


def _ln(x, g, b, eps=LN_EPS):
    mu = jnp.mean(x, axis=-1, keepdims=True)
    var = jnp.mean((x - mu) ** 2, axis=-1, keepdims=True)
    return (x - mu) * lax.rsqrt(var + eps) * g + b


# ----------------------------- fused Pallas kernel -----------------------------
def _bert_cl_kernel(ids_ref, mask_ref, s32_ref, s128_ref,
                    wqkv_ref, bqkv_ref, wog_ref, out_ref):
    B, S, H, NH, DH = BATCH, SEQ, HIDDEN, NUM_HEADS, HEAD_DIM
    V = VOCAB
    N = B * S
    G = NH * B
    scale = 1.0 / math.sqrt(DH)

    # ---- static views into the packed parameter slabs (cheap sublane slices) ----
    word_emb = s32_ref[0:V, :]                       # (V, H)
    w_pool = s32_ref[V:V + H, :]                     # (H, H)
    static_emb = s32_ref[V + H:V + H + N, :]         # (N, H) = pos_emb tiled + type_emb[0]
    vbase = V + H + N
    vrow = lambda r: s32_ref[vbase + r:vbase + r + 1, :]   # (1, H)
    type_diff = vrow(0)
    emb_g, emb_b = vrow(1), vrow(2)
    bo, ln1_g, ln1_b = vrow(3), vrow(4), vrow(5)
    bo2, ln2_g, ln2_b = vrow(6), vrow(7), vrow(8)
    b_pool = vrow(9)

    wi = s128_ref[0:H, :]                            # (H, I)
    wo2_t = s128_ref[H:2 * H, :]                     # (H, I)  == wo2.T
    w_cls_w = s128_ref[2 * H:3 * H, :]               # (H, 128) zero-padded classifier
    bi = s128_ref[3 * H:3 * H + 1, :]                # (1, I)
    b_cls_w = s128_ref[3 * H + 1:3 * H + 2, :]       # (1, 128)

    # ---- embeddings in-kernel: one_hot(token ids) @ word_emb on the MXU ----
    ids = ids_ref[:, 0:1]                                            # (N, 1) int32
    seg = ids_ref[:, 1:2].astype(jnp.float32)                        # (N, 1)
    onehot = (lax.broadcasted_iota(jnp.int32, (N, V), 1) == ids).astype(jnp.float32)
    emb = (jnp.dot(onehot, word_emb, preferred_element_type=jnp.float32)
           + static_emb + seg * type_diff)
    # dropout p=0.0 -> identity
    x0 = _ln(emb, emb_g, emb_b)                                      # (N, H)

    # ---- fused QKV, head-major batched matmul (no per-head lane slicing) ----
    xb = jnp.broadcast_to(x0[None], (3 * NH, N, H))                  # (12, N, H)
    qkv = jnp.einsum("gnh,ghd->gnd", xb, wqkv_ref[...],
                     preferred_element_type=jnp.float32) + bqkv_ref[...]
    # batch index g = head * B + b  (pure reshapes, no transpose)
    q = qkv[0 * NH:1 * NH].reshape(G, S, DH)
    k = qkv[1 * NH:2 * NH].reshape(G, S, DH)
    v = qkv[2 * NH:3 * NH].reshape(G, S, DH)

    # ---- attention over all (head, batch) pairs at once ----
    bias2 = (1.0 - mask_ref[...]) * -10000.0                         # (B, 1, S)
    bias = jnp.concatenate([bias2] * NH, axis=0)                     # (G, 1, S), g % B = b
    s = jnp.einsum("gqd,gkd->gqk", q, k,
                   preferred_element_type=jnp.float32) * scale + bias
    m = jnp.max(s, axis=-1, keepdims=True)
    e = jnp.exp(s - m)
    p = e * pl.reciprocal(jnp.sum(e, axis=-1, keepdims=True), approx=True)
    ctx = jnp.einsum("gqk,gkd->gqd", p, v,
                     preferred_element_type=jnp.float32)             # (G, S, DH)

    # ---- output projection (wo pre-split per head), residual, LN ----
    po = jnp.einsum("gsd,gdj->gsj", ctx, wog_ref[...],
                    preferred_element_type=jnp.float32)              # (G, S, H)
    attn = jnp.sum(po.reshape(NH, N, H), axis=0) + bo                # (N, H)
    x1 = _ln(attn + x0, ln1_g, ln1_b)

    # ---- FFN + residual + LN ----
    # TODO(synk): pytorch-pretrained-bert uses exact erf-GELU; tanh approximation
    # is used here (reference matches); flagged if bit-faithfulness matters.
    inter = jax.nn.gelu(jnp.dot(x1, wi, preferred_element_type=jnp.float32) + bi,
                        approximate=True)                            # (N, I)
    ffn = lax.dot_general(inter, wo2_t, (((1,), (1,)), ((), ())),
                          preferred_element_type=jnp.float32) + bo2  # (N, H)
    x2 = _ln(ffn + x1, ln2_g, ln2_b)

    # ---- pooler + classifier on ALL rows (lane-dense (N, 128) store; the
    #      wrapper picks the [CLS] rows -> no in-kernel slicing/concat) ----
    pooled = jnp.tanh(jnp.dot(x2, w_pool, preferred_element_type=jnp.float32) + b_pool)
    logits = jnp.dot(pooled, w_cls_w, preferred_element_type=jnp.float32) + b_cls_w
    out_ref[...] = logits.astype(out_ref.dtype)


# ----------------------------- one-time parameter packing -----------------------------
def pack_params(p):
    """Build the coalesced, head-major operands once (outside the per-call path)."""
    H, NH, DH, B, S = HIDDEN, NUM_HEADS, HEAD_DIM, BATCH, SEQ
    N = B * S
    f32 = jnp.float32

    # hidden-width slab: word_emb | w_pool | (pos + type0) slab | 10 vector rows
    static_emb = jnp.tile(p["pos_emb"][:S], (B, 1)) + p["type_emb"][0][None, :]
    vec_rows = jnp.stack([
        p["type_emb"][1] - p["type_emb"][0],
        p["emb_ln_g"], p["emb_ln_b"],
        p["bo"], p["ln1_g"], p["ln1_b"],
        p["bo2"], p["ln2_g"], p["ln2_b"],
        p["b_pool"],
    ], axis=0)
    slab32 = jnp.concatenate(
        [p["word_emb"], p["w_pool"], static_emb, vec_rows], axis=0).astype(f32)

    # intermediate-width (lane-dense, 128-wide) slab: wi | wo2^T | padded w_cls | bi | b_cls
    w_cls_wide = jnp.zeros((H, OUT_LANES), f32).at[:, :NUM_LABELS].set(p["w_cls"])
    b_cls_wide = jnp.zeros((1, OUT_LANES), f32).at[:, :NUM_LABELS].set(p["b_cls"][None, :])
    slab128 = jnp.concatenate(
        [p["wi"], p["wo2"].T, w_cls_wide, p["bi"][None, :], b_cls_wide], axis=0).astype(f32)

    # head-major QKV weights/biases: index g3 = which(q/k/v) * NH + head
    wqkv_heads = (p["wqkv"].reshape(H, 3, NH, DH)
                  .transpose(1, 2, 0, 3).reshape(3 * NH, H, DH).astype(f32))
    bqkv_heads = jnp.broadcast_to(
        p["bqkv"].reshape(3 * NH, 1, DH), (3 * NH, N, DH)).astype(f32)

    # per-(head, batch) output-projection weights: index g = head * B + b
    wo_g = jnp.repeat(p["wo"].reshape(NH, DH, H), B, axis=0).astype(f32)

    return {"slab32": slab32, "slab128": slab128, "wqkv_heads": wqkv_heads,
            "bqkv_heads": bqkv_heads, "wo_g": wo_g}


# ----------------------------- model forward -----------------------------
@jax.jit
def bert_cl_forward(packed, input_ids, segment_ids, input_mask):
    B, S = input_ids.shape
    N = B * S

    ids_seg = jnp.stack([input_ids.reshape(N), segment_ids.reshape(N)],
                        axis=-1).astype(jnp.int32)                   # (N, 2)
    mask3 = input_mask.astype(jnp.float32).reshape(B, 1, S)          # (B, 1, S)

    operands = [ids_seg, mask3,
                packed["slab32"], packed["slab128"],
                packed["wqkv_heads"], packed["bqkv_heads"], packed["wo_g"]]

    out = pl.pallas_call(
        _bert_cl_kernel,
        out_shape=jax.ShapeDtypeStruct((N, OUT_LANES), jnp.float32),
        grid=(1,),
        in_specs=[_fs(op.shape) for op in operands],
        out_specs=_fs((N, OUT_LANES)),
        compiler_params=pltpu.CompilerParams(dimension_semantics=("arbitrary",)),
    )(*operands)
    # [CLS] rows sit at positions 0, S, 2S, ...; the classifier logit is lane 0.
    return out[0::S, :NUM_LABELS]


# ----------------------------- pure-JAX reference -----------------------------
def reference_forward(params, input_ids, segment_ids, input_mask):
    B, S = input_ids.shape
    H, DH = HIDDEN, HEAD_DIM

    def ln(x, g, b):
        mu = x.mean(-1, keepdims=True)
        var = ((x - mu) ** 2).mean(-1, keepdims=True)
        return (x - mu) * lax.rsqrt(var + LN_EPS) * g + b

    emb = (params["word_emb"][input_ids]
           + params["pos_emb"][:S][None, :, :]
           + params["type_emb"][segment_ids])
    x = ln(emb, params["emb_ln_g"], params["emb_ln_b"])
    bias = (1.0 - input_mask.astype(jnp.float32))[:, None, None, :] * -10000.0

    qkv = jnp.einsum("bsh,hk->bsk", x, params["wqkv"], precision="highest") + params["bqkv"]
    q, k, v = jnp.split(qkv, 3, axis=-1)
    q = q.reshape(B, S, NUM_HEADS, DH)
    k = k.reshape(B, S, NUM_HEADS, DH)
    v = v.reshape(B, S, NUM_HEADS, DH)
    s = jnp.einsum("bqhd,bkhd->bhqk", q, k, precision="highest") / math.sqrt(DH) + bias
    p = jax.nn.softmax(s, axis=-1)
    ctx = jnp.einsum("bhqk,bkhd->bqhd", p, v, precision="highest").reshape(B, S, H)
    x = ln(jnp.dot(ctx, params["wo"], precision="highest") + params["bo"] + x,
           params["ln1_g"], params["ln1_b"])
    inter = jax.nn.gelu(jnp.dot(x, params["wi"], precision="highest") + params["bi"],
                        approximate=True)
    x = ln(jnp.dot(inter, params["wo2"], precision="highest") + params["bo2"] + x,
           params["ln2_g"], params["ln2_b"])
    pooled = jnp.tanh(jnp.dot(x[:, 0, :], params["w_pool"], precision="highest")
                      + params["b_pool"])
    return jnp.dot(pooled, params["w_cls"], precision="highest") + params["b_cls"]


# ----------------------------- deterministic params -----------------------------
def init_params(key):
    ks = jax.random.split(key, 12)
    nrm = lambda k, shp: (0.02 * jax.random.normal(k, shp)).astype(jnp.float32)
    H, I = HIDDEN, INTERMEDIATE
    return {
        "word_emb": nrm(ks[0], (VOCAB, H)),
        "pos_emb": nrm(ks[1], (MAX_POS, H)),
        "type_emb": nrm(ks[2], (2, H)),
        "emb_ln_g": jnp.ones((H,), jnp.float32), "emb_ln_b": jnp.zeros((H,), jnp.float32),
        # fused QKV weight: [H, 3H] = concat(Wq, Wk, Wv) along the output dim
        "wqkv": nrm(ks[3], (H, 3 * H)), "bqkv": jnp.zeros((3 * H,), jnp.float32),
        "wo": nrm(ks[4], (H, H)), "bo": jnp.zeros((H,), jnp.float32),
        "ln1_g": jnp.ones((H,), jnp.float32), "ln1_b": jnp.zeros((H,), jnp.float32),
        "wi": nrm(ks[5], (H, I)), "bi": jnp.zeros((I,), jnp.float32),
        "wo2": nrm(ks[6], (I, H)), "bo2": jnp.zeros((H,), jnp.float32),
        "ln2_g": jnp.ones((H,), jnp.float32), "ln2_b": jnp.zeros((H,), jnp.float32),
        "w_pool": nrm(ks[7], (H, H)), "b_pool": nrm(ks[8], (H,)),
        # classifier: torch Linear(H, num_labels=1); stored transposed
        "w_cls": nrm(ks[9], (H, NUM_LABELS)), "b_cls": nrm(ks[10], (NUM_LABELS,)),
    }


if __name__ == "__main__":
    key = jax.random.PRNGKey(0)
    pkey, tkey = jax.random.split(key)
    params = init_params(pkey)
    packed = pack_params(params)        # one-time weight packing (not in the hot path)

    input_ids = jax.random.randint(tkey, (BATCH, SEQ), 1, VOCAB, dtype=jnp.int32)
    input_ids = input_ids.at[1, 6:].set(0)                    # padding -> exercises the mask
    input_mask = (input_ids > 0).astype(jnp.int32)            # 1 for real tokens
    segment_ids = jnp.zeros((BATCH, SEQ), jnp.int32).at[:, SEQ // 2:].set(1)

    logits = bert_cl_forward(packed, input_ids, segment_ids, input_mask)
    logits = jax.block_until_ready(logits)

    ref = reference_forward(params, input_ids, segment_ids, input_mask)
    np.testing.assert_allclose(np.asarray(logits), np.asarray(ref), rtol=2e-2, atol=1e-3)
    assert logits.shape == (BATCH, NUM_LABELS)

    print("KERNEL_OK")
</pallas_src>

<mosaic_0001>
module attributes {stable_mosaic.version = 11 : i64} {
  func.func @_bert_cl_kernel(%arg0: i32, %arg1: memref<16x2xi32, #tpu.memory_space<vmem>>, %arg2: memref<2x1x8xf32, #tpu.memory_space<vmem>>, %arg3: memref<122x32xf32, #tpu.memory_space<vmem>>, %arg4: memref<98x128xf32, #tpu.memory_space<vmem>>, %arg5: memref<12x32x8xf32, #tpu.memory_space<vmem>>, %arg6: memref<12x16x8xf32, #tpu.memory_space<vmem>>, %arg7: memref<8x8x32xf32, #tpu.memory_space<vmem>>, %arg8: memref<16x128xf32, #tpu.memory_space<vmem>>) attributes {dimension_semantics = [#tpu.dimension_semantics<arbitrary>], iteration_bounds = array<i64: 1>, scalar_prefetch = 0 : i64, scratch_operands = 0 : i64, tpu.core_type = #tpu.core_type<tc>, window_params = [{pipeline_mode = #tpu.pipeline_mode<synchronous>, transform_indices = @transform_0, window_bounds = array<i64: 16, 2>}, {pipeline_mode = #tpu.pipeline_mode<synchronous>, transform_indices = @transform_1, window_bounds = array<i64: 2, 1, 8>}, {pipeline_mode = #tpu.pipeline_mode<synchronous>, transform_indices = @transform_2, window_bounds = array<i64: 122, 32>}, {pipeline_mode = #tpu.pipeline_mode<synchronous>, transform_indices = @transform_3, window_bounds = array<i64: 98, 128>}, {pipeline_mode = #tpu.pipeline_mode<synchronous>, transform_indices = @transform_4, window_bounds = array<i64: 12, 32, 8>}, {pipeline_mode = #tpu.pipeline_mode<synchronous>, transform_indices = @transform_5, window_bounds = array<i64: 12, 16, 8>}, {pipeline_mode = #tpu.pipeline_mode<synchronous>, transform_indices = @transform_6, window_bounds = array<i64: 8, 8, 32>}, {pipeline_mode = #tpu.pipeline_mode<synchronous>, transform_indices = @transform_7, window_bounds = array<i64: 16, 128>}]} {
    %c0 = arith.constant 0 : index
    %c0_0 = arith.constant 0 : index
    %0 = vector.load %arg3[%c0, %c0_0] : memref<122x32xf32, #tpu.memory_space<vmem>>, vector<64x32xf32>
    %c64 = arith.constant 64 : index
    %c0_1 = arith.constant 0 : index
    %1 = vector.load %arg3[%c64, %c0_1] : memref<122x32xf32, #tpu.memory_space<vmem>>, vector<32x32xf32>
    %c96 = arith.constant 96 : index
    %c0_2 = arith.constant 0 : index
    %2 = vector.load %arg3[%c96, %c0_2] : memref<122x32xf32, #tpu.memory_space<vmem>>, vector<16x32xf32>
    %c112 = arith.constant 112 : index
    %c0_3 = arith.constant 0 : index
    %3 = vector.load %arg3[%c112, %c0_3] : memref<122x32xf32, #tpu.memory_space<vmem>>, vector<1x32xf32>
    %c113 = arith.constant 113 : index
    %c0_4 = arith.constant 0 : index
    %4 = vector.load %arg3[%c113, %c0_4] : memref<122x32xf32, #tpu.memory_space<vmem>>, vector<1x32xf32>
    %c114 = arith.constant 114 : index
    %c0_5 = arith.constant 0 : index
    %5 = vector.load %arg3[%c114, %c0_5] : memref<122x32xf32, #tpu.memory_space<vmem>>, vector<1x32xf32>
    %c115 = arith.constant 115 : index
    %c0_6 = arith.constant 0 : index
    %6 = vector.load %arg3[%c115, %c0_6] : memref<122x32xf32, #tpu.memory_space<vmem>>, vector<1x32xf32>
    %c116 = arith.constant 116 : index
    %c0_7 = arith.constant 0 : index
    %7 = vector.load %arg3[%c116, %c0_7] : memref<122x32xf32, #tpu.memory_space<vmem>>, vector<1x32xf32>
    %c117 = arith.constant 117 : index
    %c0_8 = arith.constant 0 : index
    %8 = vector.load %arg3[%c117, %c0_8] : memref<122x32xf32, #tpu.memory_space<vmem>>, vector<1x32xf32>
    %c118 = arith.constant 118 : index
    %c0_9 = arith.constant 0 : index
    %9 = vector.load %arg3[%c118, %c0_9] : memref<122x32xf32, #tpu.memory_space<vmem>>, vector<1x32xf32>
    %c119 = arith.constant 119 : index
    %c0_10 = arith.constant 0 : index
    %10 = vector.load %arg3[%c119, %c0_10] : memref<122x32xf32, #tpu.memory_space<vmem>>, vector<1x32xf32>
    %c120 = arith.constant 120 : index
    %c0_11 = arith.constant 0 : index
    %11 = vector.load %arg3[%c120, %c0_11] : memref<122x32xf32, #tpu.memory_space<vmem>>, vector<1x32xf32>
    %c121 = arith.constant 121 : index
    %c0_12 = arith.constant 0 : index
    %12 = vector.load %arg3[%c121, %c0_12] : memref<122x32xf32, #tpu.memory_space<vmem>>, vector<1x32xf32>
    %c0_13 = arith.constant 0 : index
    %c0_14 = arith.constant 0 : index
    %13 = vector.load %arg4[%c0_13, %c0_14] : memref<98x128xf32, #tpu.memory_space<vmem>>, vector<32x128xf32>
    %c32 = arith.constant 32 : index
    %c0_15 = arith.constant 0 : index
    %14 = vector.load %arg4[%c32, %c0_15] : memref<98x128xf32, #tpu.memory_space<vmem>>, vector<32x128xf32>
    %c64_16 = arith.constant 64 : index
    %c0_17 = arith.constant 0 : index
    %15 = vector.load %arg4[%c64_16, %c0_17] : memref<98x128xf32, #tpu.memory_space<vmem>>, vector<32x128xf32>
    %c96_18 = arith.constant 96 : index
    %c0_19 = arith.constant 0 : index
    %16 = vector.load %arg4[%c96_18, %c0_19] : memref<98x128xf32, #tpu.memory_space<vmem>>, vector<1x128xf32>
    %c97 = arith.constant 97 : index
    %c0_20 = arith.constant 0 : index
    %17 = vector.load %arg4[%c97, %c0_20] : memref<98x128xf32, #tpu.memory_space<vmem>>, vector<1x128xf32>
    %c0_21 = arith.constant 0 : index
    %c0_22 = arith.constant 0 : index
    %18 = vector.load %arg1[%c0_21, %c0_22] : memref<16x2xi32, #tpu.memory_space<vmem>>, vector<16x1xi32>
    %c0_23 = arith.constant 0 : index
    %c1 = arith.constant 1 : index
    %19 = vector.load %arg1[%c0_23, %c1] : memref<16x2xi32, #tpu.memory_space<vmem>>, vector<16x1xi32>
    %20 = arith.sitofp %19 : vector<16x1xi32> to vector<16x1xf32>
    %21 = tpu.iota {dimensions = array<i32: 1>} : vector<16x64xi32>
    %22 = vector.broadcast %18 : vector<16x1xi32> to vector<16x64xi32>
    %23 = arith.cmpi eq, %21, %22 : vector<16x64xi32>
    %24 = arith.extui %23 : vector<16x64xi1> to vector<16x64xi32>
    %25 = arith.sitofp %24 : vector<16x64xi32> to vector<16x64xf32>
    %cst = arith.constant dense<0.000000e+00> : vector<16x32xf32>
    %26 = tpu.matmul %25, %0, %cst {dimension_numbers = #tpu.dot_dimension_numbers<[1], [0], [0], [1], [0, 0, 1, 1], [], []>} : vector<16x64xf32>, vector<64x32xf32>, vector<16x32xf32> -> vector<16x32xf32>
    %27 = arith.addf %26, %2 : vector<16x32xf32>
    %28 = vector.broadcast %20 : vector<16x1xf32> to vector<16x32xf32>
    %29 = vector.broadcast %3 : vector<1x32xf32> to vector<16x32xf32>
    %30 = arith.mulf %28, %29 : vector<16x32xf32>
    %31 = arith.addf %27, %30 : vector<16x32xf32>
    %cst_24 = arith.constant dense<0.000000e+00> : vector<16xf32>
    %32 = vector.multi_reduction <add>, %31, %cst_24 [1] : vector<16x32xf32> to vector<16xf32>
    %33 = vector.shape_cast %32 : vector<16xf32> to vector<16x1xf32>
    %cst_25 = arith.constant 3.200000e+01 : f32
    %34 = vector.broadcast %cst_25 : f32 to vector<16x1xf32>
    %35 = arith.divf %33, %34 : vector<16x1xf32>
    %36 = vector.broadcast %35 : vector<16x1xf32> to vector<16x32xf32>
    %37 = arith.subf %31, %36 : vector<16x32xf32>
    %38 = arith.mulf %37, %37 : vector<16x32xf32>
    %cst_26 = arith.constant dense<0.000000e+00> : vector<16xf32>
    %39 = vector.multi_reduction <add>, %38, %cst_26 [1] : vector<16x32xf32> to vector<16xf32>
    %40 = vector.shape_cast %39 : vector<16xf32> to vector<16x1xf32>
    %cst_27 = arith.constant 3.200000e+01 : f32
    %41 = vector.broadcast %cst_27 : f32 to vector<16x1xf32>
    %42 = arith.divf %40, %41 : vector<16x1xf32>
    %43 = vector.broadcast %35 : vector<16x1xf32> to vector<16x32xf32>
    %44 = arith.subf %31, %43 : vector<16x32xf32>
    %cst_28 = arith.constant 9.99999996E-13 : f32
    %45 = vector.broadcast %cst_28 : f32 to vector<16x1xf32>
    %46 = arith.addf %42, %45 : vector<16x1xf32>
    %47 = math.rsqrt %46 : vector<16x1xf32>
    %48 = vector.broadcast %47 : vector<16x1xf32> to vector<16x32xf32>
    %49 = arith.mulf %44, %48 : vector<16x32xf32>
    %50 = vector.broadcast %4 : vector<1x32xf32> to vector<16x32xf32>
    %51 = arith.mulf %49, %50 : vector<16x32xf32>
    %52 = vector.broadcast %5 : vector<1x32xf32> to vector<16x32xf32>
    %53 = arith.addf %51, %52 : vector<16x32xf32>
    %54 = vector.shape_cast %53 : vector<16x32xf32> to vector<1x16x32xf32>
    %55 = vector.shape_cast %54 : vector<1x16x32xf32> to vector<1x16x32xf32>
    %56 = vector.broadcast %55 : vector<1x16x32xf32> to vector<12x16x32xf32>
    %c0_29 = arith.constant 0 : index
    %c0_30 = arith.constant 0 : index
    %c0_31 = arith.constant 0 : index
    %57 = vector.load %arg5[%c0_29, %c0_30, %c0_31] : memref<12x32x8xf32, #tpu.memory_space<vmem>>, vector<12x32x8xf32>
    "tpu.trace_start"() <{level = 10 : i32, message = "gnh,ghd->gnd"}> : () -> ()
    %cst_32 = arith.constant dense<0.000000e+00> : vector<12x16x8xf32>
    %58 = tpu.matmul %56, %57, %cst_32 {dimension_numbers = #tpu.dot_dimension_numbers<[2], [1], [1], [2], [0, 0, 0, 1, 1, 2], [0], [0]>} : vector<12x16x32xf32>, vector<12x32x8xf32>, vector<12x16x8xf32> -> vector<12x16x8xf32>
    "tpu.trace_stop"() : () -> ()
    %c0_33 = arith.constant 0 : index
    %c0_34 = arith.constant 0 : index
    %c0_35 = arith.constant 0 : index
    %59 = vector.load %arg6[%c0_33, %c0_34, %c0_35] : memref<12x16x8xf32, #tpu.memory_space<vmem>>, vector<12x16x8xf32>
    %60 = arith.addf %58, %59 : vector<12x16x8xf32>
    %61 = vector.extract_strided_slice %60 {offsets = [0, 0, 0], sizes = [4, 16, 8], strides = [1, 1, 1]} : vector<12x16x8xf32> to vector<4x16x8xf32>
    %62 = vector.shape_cast %61 : vector<4x16x8xf32> to vector<8x8x8xf32>
    %63 = vector.extract_strided_slice %60 {offsets = [4, 0, 0], sizes = [4, 16, 8], strides = [1, 1, 1]} : vector<12x16x8xf32> to vector<4x16x8xf32>
    %64 = vector.shape_cast %63 : vector<4x16x8xf32> to vector<8x8x8xf32>
    %65 = vector.extract_strided_slice %60 {offsets = [8, 0, 0], sizes = [4, 16, 8], strides = [1, 1, 1]} : vector<12x16x8xf32> to vector<4x16x8xf32>
    %66 = vector.shape_cast %65 : vector<4x16x8xf32> to vector<8x8x8xf32>
    %c0_36 = arith.constant 0 : index
    %c0_37 = arith.constant 0 : index
    %c0_38 = arith.constant 0 : index
    %67 = vector.load %arg2[%c0_36, %c0_37, %c0_38] : memref<2x1x8xf32, #tpu.memory_space<vmem>>, vector<2x1x8xf32>
    %cst_39 = arith.constant 1.000000e+00 : f32
    %68 = vector.broadcast %cst_39 : f32 to vector<2x1x8xf32>
    %69 = arith.subf %68, %67 : vector<2x1x8xf32>
    %cst_40 = arith.constant -1.000000e+04 : f32
    %70 = vector.broadcast %cst_40 : f32 to vector<2x1x8xf32>
    %71 = arith.mulf %69, %70 : vector<2x1x8xf32>
    %72 = tpu.concatenate %71, %71, %71, %71 in 0 : vector<2x1x8xf32>, vector<2x1x8xf32>, vector<2x1x8xf32>, vector<2x1x8xf32> -> vector<8x1x8xf32>
    "tpu.trace_start"() <{level = 10 : i32, message = "gqd,gkd->gqk"}> : () -> ()
    %cst_41 = arith.constant dense<0.000000e+00> : vector<8x8x8xf32>
    %73 = tpu.matmul %62, %64, %cst_41 {dimension_numbers = #tpu.dot_dimension_numbers<[2], [2], [1], [1], [0, 0, 0, 1, 1, 1], [0], [0]>} : vector<8x8x8xf32>, vector<8x8x8xf32>, vector<8x8x8xf32> -> vector<8x8x8xf32>
    "tpu.trace_stop"() : () -> ()
    %cst_42 = arith.constant 0.353553385 : f32
    %74 = vector.broadcast %cst_42 : f32 to vector<8x8x8xf32>
    %75 = arith.mulf %73, %74 : vector<8x8x8xf32>
    %76 = vector.broadcast %72 : vector<8x1x8xf32> to vector<8x8x8xf32>
    %77 = arith.addf %75, %76 : vector<8x8x8xf32>
    %cst_43 = arith.constant dense<0xFF800000> : vector<8x8xf32>
    %78 = vector.multi_reduction <maximumf>, %77, %cst_43 [2] : vector<8x8x8xf32> to vector<8x8xf32>
    %79 = vector.shape_cast %78 : vector<8x8xf32> to vector<8x8x1xf32>
    %80 = vector.broadcast %79 : vector<8x8x1xf32> to vector<8x8x8xf32>
    %81 = arith.subf %77, %80 : vector<8x8x8xf32>
    %82 = math.exp %81 : vector<8x8x8xf32>
    %cst_44 = arith.constant dense<0.000000e+00> : vector<8x8xf32>
    %83 = vector.multi_reduction <add>, %82, %cst_44 [2] : vector<8x8x8xf32> to vector<8x8xf32>
    %84 = vector.shape_cast %83 : vector<8x8xf32> to vector<8x8x1xf32>
    %85 = tpu.reciprocal %84 {approx = true} : vector<8x8x1xf32> -> vector<8x8x1xf32>
    %86 = vector.broadcast %85 : vector<8x8x1xf32> to vector<8x8x8xf32>
    %87 = arith.mulf %82, %86 : vector<8x8x8xf32>
    "tpu.trace_start"() <{level = 10 : i32, message = "gqk,gkd->gqd"}> : () -> ()
    %cst_45 = arith.constant dense<0.000000e+00> : vector<8x8x8xf32>
    %88 = tpu.matmul %87, %66, %cst_45 {dimension_numbers = #tpu.dot_dimension_numbers<[2], [1], [1], [2], [0, 0, 0, 1, 1, 2], [0], [0]>} : vector<8x8x8xf32>, vector<8x8x8xf32>, vector<8x8x8xf32> -> vector<8x8x8xf32>
    "tpu.trace_stop"() : () -> ()
    %c0_46 = arith.constant 0 : index
    %c0_47 = arith.constant 0 : index
    %c0_48 = arith.constant 0 : index
    %89 = vector.load %arg7[%c0_46, %c0_47, %c0_48] : memref<8x8x32xf32, #tpu.memory_space<vmem>>, vector<8x8x32xf32>
    "tpu.trace_start"() <{level = 10 : i32, message = "gsd,gdj->gsj"}> : () -> ()
    %cst_49 = arith.constant dense<0.000000e+00> : vector<8x8x32xf32>
    %90 = tpu.matmul %88, %89, %cst_49 {dimension_numbers = #tpu.dot_dimension_numbers<[2], [1], [1], [2], [0, 0, 0, 1, 1, 2], [0], [0]>} : vector<8x8x8xf32>, vector<8x8x32xf32>, vector<8x8x32xf32> -> vector<8x8x32xf32>
    "tpu.trace_stop"() : () -> ()
    %91 = vector.shape_cast %90 : vector<8x8x32xf32> to vector<4x16x32xf32>
    %cst_50 = arith.constant dense<0.000000e+00> : vector<16x32xf32>
    %92 = vector.multi_reduction <add>, %91, %cst_50 [0] : vector<4x16x32xf32> to vector<16x32xf32>
    %93 = vector.broadcast %6 : vector<1x32xf32> to vector<16x32xf32>
    %94 = arith.addf %92, %93 : vector<16x32xf32>
    %95 = arith.addf %94, %53 : vector<16x32xf32>
    %cst_51 = arith.constant dense<0.000000e+00> : vector<16xf32>
    %96 = vector.multi_reduction <add>, %95, %cst_51 [1] : vector<16x32xf32> to vector<16xf32>
    %97 = vector.shape_cast %96 : vector<16xf32> to vector<16x1xf32>
    %cst_52 = arith.constant 3.200000e+01 : f32
    %98 = vector.broadcast %cst_52 : f32 to vector<16x1xf32>
    %99 = arith.divf %97, %98 : vector<16x1xf32>
    %100 = vector.broadcast %99 : vector<16x1xf32> to vector<16x32xf32>
    %101 = arith.subf %95, %100 : vector<16x32xf32>
    %102 = arith.mulf %101, %101 : vector<16x32xf32>
    %cst_53 = arith.constant dense<0.000000e+00> : vector<16xf32>
    %103 = vector.multi_reduction <add>, %102, %cst_53 [1] : vector<16x32xf32> to vector<16xf32>
    %104 = vector.shape_cast %103 : vector<16xf32> to vector<16x1xf32>
    %cst_54 = arith.constant 3.200000e+01 : f32
    %105 = vector.broadcast %cst_54 : f32 to vector<16x1xf32>
    %106 = arith.divf %104, %105 : vector<16x1xf32>
    %107 = vector.broadcast %99 : vector<16x1xf32> to vector<16x32xf32>
    %108 = arith.subf %95, %107 : vector<16x32xf32>
    %cst_55 = arith.constant 9.99999996E-13 : f32
    %109 = vector.broadcast %cst_55 : f32 to vector<16x1xf32>
    %110 = arith.addf %106, %109 : vector<16x1xf32>
    %111 = math.rsqrt %110 : vector<16x1xf32>
    %112 = vector.broadcast %111 : vector<16x1xf32> to vector<16x32xf32>
    %113 = arith.mulf %108, %112 : vector<16x32xf32>
    %114 = vector.broadcast %7 : vector<1x32xf32> to vector<16x32xf32>
    %115 = arith.mulf %113, %114 : vector<16x32xf32>
    %116 = vector.broadcast %8 : vector<1x32xf32> to vector<16x32xf32>
    %117 = arith.addf %115, %116 : vector<16x32xf32>
    %cst_56 = arith.constant dense<0.000000e+00> : vector<16x128xf32>
    %118 = tpu.matmul %117, %13, %cst_56 {dimension_numbers = #tpu.dot_dimension_numbers<[1], [0], [0], [1], [0, 0, 1, 1], [], []>} : vector<16x32xf32>, vector<32x128xf32>, vector<16x128xf32> -> vector<16x128xf32>
    %119 = vector.broadcast %16 : vector<1x128xf32> to vector<16x128xf32>
    %120 = arith.addf %118, %119 : vector<16x128xf32>
    %121 = arith.mulf %120, %120 : vector<16x128xf32>
    %122 = arith.mulf %120, %121 : vector<16x128xf32>
    %cst_57 = arith.constant 4.471500e-02 : f32
    %123 = vector.broadcast %cst_57 : f32 to vector<16x128xf32>
    %124 = arith.mulf %123, %122 : vector<16x128xf32>
    %125 = arith.addf %120, %124 : vector<16x128xf32>
    %cst_58 = arith.constant 0.797884583 : f32
    %126 = vector.broadcast %cst_58 : f32 to vector<16x128xf32>
    %127 = arith.mulf %126, %125 : vector<16x128xf32>
    %128 = math.tanh %127 : vector<16x128xf32>
    %cst_59 = arith.constant 1.000000e+00 : f32
    %129 = vector.broadcast %cst_59 : f32 to vector<16x128xf32>
    %130 = arith.addf %129, %128 : vector<16x128xf32>
    %cst_60 = arith.constant 5.000000e-01 : f32
    %131 = vector.broadcast %cst_60 : f32 to vector<16x128xf32>
    %132 = arith.mulf %131, %130 : vector<16x128xf32>
    %133 = arith.mulf %120, %132 : vector<16x128xf32>
    %cst_61 = arith.constant dense<0.000000e+00> : vector<16x32xf32>
    %134 = tpu.matmul %133, %14, %cst_61 {dimension_numbers = #tpu.dot_dimension_numbers<[1], [1], [0], [0], [0, 0, 1, 0], [], []>} : vector<16x128xf32>, vector<32x128xf32>, vector<16x32xf32> -> vector<16x32xf32>
    %135 = vector.broadcast %9 : vector<1x32xf32> to vector<16x32xf32>
    %136 = arith.addf %134, %135 : vector<16x32xf32>
    %137 = arith.addf %136, %117 : vector<16x32xf32>
    %cst_62 = arith.constant dense<0.000000e+00> : vector<16xf32>
    %138 = vector.multi_reduction <add>, %137, %cst_62 [1] : vector<16x32xf32> to vector<16xf32>
    %139 = vector.shape_cast %138 : vector<16xf32> to vector<16x1xf32>
    %cst_63 = arith.constant 3.200000e+01 : f32
    %140 = vector.broadcast %cst_63 : f32 to vector<16x1xf32>
    %141 = arith.divf %139, %140 : vector<16x1xf32>
    %142 = vector.broadcast %141 : vector<16x1xf32> to vector<16x32xf32>
    %143 = arith.subf %137, %142 : vector<16x32xf32>
    %144 = arith.mulf %143, %143 : vector<16x32xf32>
    %cst_64 = arith.constant dense<0.000000e+00> : vector<16xf32>
    %145 = vector.multi_reduction <add>, %144, %cst_64 [1] : vector<16x32xf32> to vector<16xf32>
    %146 = vector.shape_cast %145 : vector<16xf32> to vector<16x1xf32>
    %cst_65 = arith.constant 3.200000e+01 : f32
    %147 = vector.broadcast %cst_65 : f32 to vector<16x1xf32>
    %148 = arith.divf %146, %147 : vector<16x1xf32>
    %149 = vector.broadcast %141 : vector<16x1xf32> to vector<16x32xf32>
    %150 = arith.subf %137, %149 : vector<16x32xf32>
    %cst_66 = arith.constant 9.99999996E-13 : f32
    %151 = vector.broadcast %cst_66 : f32 to vector<16x1xf32>
    %152 = arith.addf %148, %151 : vector<16x1xf32>
    %153 = math.rsqrt %152 : vector<16x1xf32>
    %154 = vector.broadcast %153 : vector<16x1xf32> to vector<16x32xf32>
    %155 = arith.mulf %150, %154 : vector<16x32xf32>
    %156 = vector.broadcast %10 : vector<1x32xf32> to vector<16x32xf32>
    %157 = arith.mulf %155, %156 : vector<16x32xf32>
    %158 = vector.broadcast %11 : vector<1x32xf32> to vector<16x32xf32>
    %159 = arith.addf %157, %158 : vector<16x32xf32>
    %cst_67 = arith.constant dense<0.000000e+00> : vector<16x32xf32>
    %160 = tpu.matmul %159, %1, %cst_67 {dimension_numbers = #tpu.dot_dimension_numbers<[1], [0], [0], [1], [0, 0, 1, 1], [], []>} : vector<16x32xf32>, vector<32x32xf32>, vector<16x32xf32> -> vector<16x32xf32>
    %161 = vector.broadcast %12 : vector<1x32xf32> to vector<16x32xf32>
    %162 = arith.addf %160, %161 : vector<16x32xf32>
    %163 = math.tanh %162 : vector<16x32xf32>
    %cst_68 = arith.constant dense<0.000000e+00> : vector<16x128xf32>
    %164 = tpu.matmul %163, %15, %cst_68 {dimension_numbers = #tpu.dot_dimension_numbers<[1], [0], [0], [1], [0, 0, 1, 1], [], []>} : vector<16x32xf32>, vector<32x128xf32>, vector<16x128xf32> -> vector<16x128xf32>
    %165 = vector.broadcast %17 : vector<1x128xf32> to vector<16x128xf32>
    %166 = arith.addf %164, %165 : vector<16x128xf32>
    %c0_69 = arith.constant 0 : index
    %c0_70 = arith.constant 0 : index
    %167 = vector.load %arg8[%c0_69, %c0_70] : memref<16x128xf32, #tpu.memory_space<vmem>>, vector<16x128xf32>
    tpu.vector_store %arg8[%c0_69, %c0_70], %166 {strides = array<i32>} : memref<16x128xf32, #tpu.memory_space<vmem>>, vector<16x128xf32>,
    return
  }
  func.func @transform_0(%arg0: i32) -> (i32, i32) {
    %c0_i32 = arith.constant 0 : i32
    %c0_i32_0 = arith.constant 0 : i32
    %c0_i32_1 = arith.constant 0 : i32
    return %c0_i32, %c0_i32_0 : i32, i32
  }
  func.func @transform_1(%arg0: i32) -> (i32, i32, i32) {
    %c0_i32 = arith.constant 0 : i32
    %c0_i32_0 = arith.constant 0 : i32
    %c0_i32_1 = arith.constant 0 : i32
    %c0_i32_2 = arith.constant 0 : i32
    return %c0_i32, %c0_i32_0, %c0_i32_1 : i32, i32, i32
  }
  func.func @transform_2(%arg0: i32) -> (i32, i32) {
    %c0_i32 = arith.constant 0 : i32
    %c0_i32_0 = arith.constant 0 : i32
    %c0_i32_1 = arith.constant 0 : i32
    return %c0_i32, %c0_i32_0 : i32, i32
  }
  func.func @transform_3(%arg0: i32) -> (i32, i32) {
    %c0_i32 = arith.constant 0 : i32
    %c0_i32_0 = arith.constant 0 : i32
    %c0_i32_1 = arith.constant 0 : i32
    return %c0_i32, %c0_i32_0 : i32, i32
  }
  func.func @transform_4(%arg0: i32) -> (i32, i32, i32) {
    %c0_i32 = arith.constant 0 : i32
    %c0_i32_0 = arith.constant 0 : i32
    %c0_i32_1 = arith.constant 0 : i32
    %c0_i32_2 = arith.constant 0 : i32
    return %c0_i32, %c0_i32_0, %c0_i32_1 : i32, i32, i32
  }
  func.func @transform_5(%arg0: i32) -> (i32, i32, i32) {
    %c0_i32 = arith.constant 0 : i32
    %c0_i32_0 = arith.constant 0 : i32
    %c0_i32_1 = arith.constant 0 : i32
    %c0_i32_2 = arith.constant 0 : i32
    return %c0_i32, %c0_i32_0, %c0_i32_1 : i32, i32, i32
  }
  func.func @transform_6(%arg0: i32) -> (i32, i32, i32) {
    %c0_i32 = arith.constant 0 : i32
    %c0_i32_0 = arith.constant 0 : i32
    %c0_i32_1 = arith.constant 0 : i32
    %c0_i32_2 = arith.constant 0 : i32
    return %c0_i32, %c0_i32_0, %c0_i32_1 : i32, i32, i32
  }
  func.func @transform_7(%arg0: i32) -> (i32, i32) {
    %c0_i32 = arith.constant 0 : i32
    %c0_i32_0 = arith.constant 0 : i32
    %c0_i32_1 = arith.constant 0 : i32
    return %c0_i32, %c0_i32_0 : i32, i32
  }
}

</mosaic_0001>

<bundles_post_ra>
// kernel: bert_cl_forward.1
= control target key start
LH: loop header
LB: loop body
LE: loop exit
PB: predicated region body
PF: predicated region fallthrough
CT: control target
= control target key end

     0   :  { %v4317_v0 = vmov 0   ;;  %v4318_v15 = vmov 1   ;;  %v68_v18 = vlaneseq  ;;  %vm82_vm0 = vcmask 523264   ;;  %s4963_s0 = inlined_call_operand.vmem [shape: s32[16,2], index: 0, kind: input, shape index: {}]   ;;  %s4964_s2 = inlined_call_operand.vmem [shape: f32[122,32], index: 2, kind: input, shape index: {}]   ;;  %s4965_s4 = inlined_call_operand.vmem [shape: f32[12,32,8], index: 4, kind: input, shape index: {}]   ;;  %s4966_s5 = inlined_call_operand.vmem [shape: f32[12,16,8], index: 5, kind: input, shape index: {}]   ;;  %s4967_s1 = inlined_call_operand.vmem [shape: f32[2,1,8], index: 1, kind: input, shape index: {}]   ;;  %s4968_s6 = inlined_call_operand.vmem [shape: f32[8,8,32], index: 6, kind: input, shape index: {}]   ;;  %s4969_s3 = inlined_call_operand.vmem [shape: f32[98,128], index: 3, kind: input, shape index: {}]   ;;  %s4970_s7 = inlined_call_operand.vmem [shape: f32[16,128], index: 7, kind: output, shape index: {}]  }
   0x1   :  { %4262 = vset.pattern.permute.xlu0 %v4317_v0  ;;  %v64_v1 = vld [vmem:[%s4963_s0] sm:$0xff]  ;;  %v27_v3 = vld [vmem:[%s4964_s2 + $0x8] sm:$0xff]  ;;  %v28_v4 = vld [vmem:[%s4964_s2 + $0x10] sm:$0xff]  ;;  %4263 = vset.pattern.permute.xlu1 %v4318_v15  ;;  %v4319_v21 = vmov 0.0   ;;  %vm182_vm3 = vcmask 261120   ;;  %vm4320_vm4 = vmmov 0  }
   0x2   :  { %v26_v2 = vld [vmem:[%s4964_s2] sm:$0xff]  ;;  %71 = vperm.xlu0 %4262, %v64_v1   ;;  %v29_v5 = vld [vmem:[%s4964_s2 + $0x18] sm:$0xff]  ;;  %v65_v6 = vld [vmem:[%s4963_s0 + $0x8] sm:$0xff]  ;;  %v66_v14 = vcvt.s32.f32 %v64_v1  ;;  %v69_v19 = vand.u32 127, %v68_v18  ;;  %vm1206_vm5 = vcmask 64512  }
   0x3   :  { %v4114_v7 = vpack.c.bf16 %v27_v3, %v26_v2  ;;  %v4118_v8 = vpack.c.bf16 %v29_v5, %v28_v4  ;;  %v30_v9 = vld [vmem:[%s4964_s2 + $0x20] sm:$0xff]  ;;  %v31_v10 = vld [vmem:[%s4964_s2 + $0x28] sm:$0xff]  ;;  %v32_v12 = vld [vmem:[%s4964_s2 + $0x30] sm:$0xff]  ;;  %v67_v16 = vcvt.s32.f32 %v65_v6 }
   0x4   :  { %v4122_v11 = vpack.c.bf16 %v31_v10, %v30_v9  ;;  %v33_v13 = vld [vmem:[%s4964_s2 + $0x38] sm:$0xff]  ;;  %166 = vperm.xlu1 %4263, %v66_v14   ;;  %v3571_v26 = vld [vmem:[%s4964_s2 + $0x70] ss:$0 sm:$0xff]  ;;  %v39_v28 = vld [vmem:[%s4964_s2 + $0x68] sm:$0xff] }
   0x5   :  { %4115 = vmatprep.subr.bf16.mxu0 %v4114_v7  ;;  %v4126_v17 = vpack.c.bf16 %v33_v13, %v32_v12  ;;  %v38_v30 = vld [vmem:[%s4964_s2 + $0x60] sm:$0xff]  ;;  %v223_v51 = vld [vmem:[%s4965_s4 + $0x8] sm:$0xff]  ;;  %v224_v56 = vld [vmem:[%s4965_s4 + $0x10] sm:$0xff] }
   0x6   :  { %74 = vperm.xlu0 %4262, %v65_v6   ;;  %4117 = vmatpush3.bf16.msra.mxu0 %v4114_v7  ;;  %v222_v50 = vld [vmem:[%s4965_s4] sm:$0xff]  ;;  %v231_v54 = vld [vmem:[%s4965_s4 + $0x48] sm:$0xff]  ;;  %v225_v57 = vld [vmem:[%s4965_s4 + $0x18] sm:$0xff] }
   0x7   :  { %4119 = vmatprep.subr.bf16.mxu0 %v4118_v8  ;;  %v230_v52 = vld [vmem:[%s4965_s4 + $0x40] sm:$0xff]  ;;  %v4130_v53 = vpack.c.bf16 %v223_v51, %v222_v50  ;;  %v232_v58 = vld [vmem:[%s4965_s4 + $0x50] sm:$0xff]  ;;  %v4134_v59 = vpack.c.bf16 %v225_v57, %v224_v56  ;;  %v233_v60 = vld [vmem:[%s4965_s4 + $0x58] sm:$0xff] }
   0x8   :  { %171 = vperm.xlu1 %4263, %v67_v16   ;;  %v4146_v55 = vpack.c.bf16 %v231_v54, %v230_v52  ;;  %v4150_v61 = vpack.c.bf16 %v233_v60, %v232_v58  ;;  %v226_v62 = vld [vmem:[%s4965_s4 + $0x20] sm:$0xff]  ;;  %v227_v63 = vld [vmem:[%s4965_s4 + $0x28] sm:$0xff]  ;;  %v3573_v13 = vld [vmem:[%s4964_s2 + $0x72] ss:$0 sm:$0xff] }
   0x9   :  { %4131 = vmatprep.subr.bf16.mxu1 %v4130_v53  ;;  %v238_v0 = vld [vmem:[%s4965_s4 + $0x80] sm:$0xff]  ;;  %v4138_v1 = vpack.c.bf16 %v227_v63, %v226_v62  ;;  %v239_v2 = vld [vmem:[%s4965_s4 + $0x88] sm:$0xff]  ;;  %v252_v58 = vld [vmem:[%s4965_s4 + $0xf0] sm:$0xff] }
   0xa   :  { %4121 = vmatpush3.bf16.msra.mxu0 %v4118_v8  ;;  %4264 = vset.pattern.permute.xlu0 %v4318_v15  ;;  %v4162_v3 = vpack.c.bf16 %v239_v2, %v238_v0  ;;  %v250_v51 = vld [vmem:[%s4965_s4 + $0xe0] sm:$0xff]  ;;  %v251_v52 = vld [vmem:[%s4965_s4 + $0xe8] sm:$0xff]  ;;  %v264_v60 = vld [vmem:[%s4965_s4 + $0x150] sm:$0xff] }
   0xb   :  { %4123 = vmatprep.subr.bf16.mxu0 %v4122_v11  ;;  %4133 = vmatpush3.bf16.msra.mxu1 %v4130_v53  ;;  %v262_v54 = vld [vmem:[%s4965_s4 + $0x140] sm:$0xff]  ;;  %v4186_v56 = vpack.c.bf16 %v251_v52, %v250_v51  ;;  %v259_v0 = vld [vmem:[%s4965_s4 + $0x128] sm:$0xff] }
   0xc   :  { %4135 = vmatprep.subr.bf16.mxu1 %v4134_v59  ;;  %v258_v63 = vld [vmem:[%s4965_s4 + $0x120] sm:$0xff] }
   0xd   :  { %v4202_v2 = vpack.c.bf16 %v259_v0, %v258_v63  ;;  %v274_v52 = vld [vmem:[%s4966_s5 + $0x20] sm:$0xff]  ;;  %v276_v63 = vld [vmem:[%s4966_s5 + $0x30] sm:$0xff]  ;;  %v287_v0 = vld [vmem:[%s4966_s5 + $0x88] sm:$0xff] }
   0xe   :  { %4125 = vmatpush3.bf16.msra.mxu0 %v4122_v11  ;;  %v3572_v11 = vld [vmem:[%s4964_s2 + $0x71] ss:$0 sm:$0xff] }
   0xf   :  { %4127 = vmatprep.subr.bf16.mxu0 %v4126_v17  ;;  %4137 = vmatpush3.bf16.msra.mxu1 %v4134_v59  ;;  %v253_v59 = vld [vmem:[%s4965_s4 + $0xf8] sm:$0xff] }
  0x10   :  { %4139 = vmatprep.subr.bf16.mxu1 %v4138_v1  ;;  %v4190_v62 = vpack.c.bf16 %v253_v59, %v252_v58  ;;  %v277_v59 = vld [vmem:[%s4966_s5 + $0x38] sm:$0xff] }
  0x12   :  { %4129 = vmatpush3.bf16.msra.mxu0 %v4126_v17 }
  0x13   :  { %4147 = vmatprep.subr.bf16.mxu0 %v4146_v55 }
  0x81   :  { %v72_v20 = vpop.permute.xlu0 %71 }
  0x82   :  { %vm76_vm1 = vcmp.eq.s32.totalorder %v69_v19, %v72_v20 }
  0x83   :  { %v3567_v22 = vsel %vm76_vm1, 1.0, %v4319_v21  ;;  %v167_v25 = vpop.permute.xlu1 %166 }
  0x84   :  { %3815 = vmatprep.mubr.msk.f32.mxu0 %vm82_vm0, %v3567_v22  ;;  %v178_v31 = vmul.f32 %v3571_v26, %v167_v25  ;;  %v229_v22 = vld [vmem:[%s4965_s4 + $0x38] sm:$0xff] }
  0x85   :  { %v75_v23 = vpop.permute.xlu0 %74 }
  0x86   :  { %vm77_vm2 = vcmp.eq.s32.totalorder %v69_v19, %v75_v23  ;;  %v228_v19 = vld [vmem:[%s4965_s4 + $0x30] sm:$0xff] }
  0x87   :  { %v3568_v24 = vsel %vm77_vm2, 1.0, %v4319_v21  ;;  %v172_v27 = vpop.permute.xlu1 %171  ;;  %v240_v23 = vld [vmem:[%s4965_s4 + $0x90] sm:$0xff] }
  0x88   :  { %3816 = vmatmul.mubr.msk.f32.vlgmr.msra.gmra.mrb[0].mxu0 %vm82_vm0, %v3568_v24  ;;  %v179_v29 = vmul.f32 %v3571_v26, %v172_v27  ;;  %v241_v24 = vld [vmem:[%s4965_s4 + $0x98] sm:$0xff]  ;;  %v234_v26 = vld [vmem:[%s4965_s4 + $0x60] sm:$0xff]  ;;  %v4142_v27 = vpack.c.bf16 %v229_v22, %v228_v19 }
  0x89   :  { %4149 = vmatpush3.bf16.msra.mxu0 %v4146_v55  ;;  %v263_v55 = vld [vmem:[%s4965_s4 + $0x148] sm:$0xff] }
  0x8a   :  { %4151 = vmatprep.subr.bf16.mxu0 %v4150_v61  ;;  %v4210_v57 = vpack.c.bf16 %v263_v55, %v262_v54  ;;  %v285_v54 = vld [vmem:[%s4966_s5 + $0x78] sm:$0xff]  ;;  %v284_v55 = vld [vmem:[%s4966_s5 + $0x70] sm:$0xff] }
  0x8d   :  { %4153 = vmatpush3.bf16.msra.mxu0 %v4150_v61  ;;  %v265_v61 = vld [vmem:[%s4965_s4 + $0x158] sm:$0xff] }
  0x8e   :  { %4163 = vmatprep.subr.bf16.mxu0 %v4162_v3 }
 0x15b   :  { %v3817_v32 = vpop.f32.mrb[0].mxu0 }
 0x15c   :  { %v161_v33 = vadd.f32 %v3817_v32, %v39_v28  ;;  %v155_v34 = vpop.f32.mrb[1].mxu0  ;;  %v4166_v28 = vpack.c.bf16 %v241_v24, %v240_v23  ;;  %v270_v24 = vld [vmem:[%s4966_s5] sm:$0xff] }
 0x15d   :  { %v156_v35 = vadd.f32 %v155_v34, %v38_v30  ;;  %v246_v30 = vld [vmem:[%s4965_s4 + $0xc0] sm:$0xff]  ;;  %v236_v34 = vld [vmem:[%s4965_s4 + $0x70] sm:$0xff] }
 0x15e   :  { %v181_v36 = vadd.f32 %v179_v29, %v161_v33  ;;  %v235_v29 = vld [vmem:[%s4965_s4 + $0x68] sm:$0xff] }
 0x15f   :  { %v180_v37 = vadd.f32 %v178_v31, %v156_v35  ;;  %v247_v31 = vld [vmem:[%s4965_s4 + $0xc8] sm:$0xff]  ;;  %v4154_v32 = vpack.c.bf16 %v235_v29, %v234_v26  ;;  %v237_v35 = vld [vmem:[%s4965_s4 + $0x78] sm:$0xff] }
 0x160   :  { %v186_v38 = vsel %vm182_vm3, %v181_v36, 0.0  ;;  %v4178_v33 = vpack.c.bf16 %v247_v31, %v246_v30  ;;  %v271_v29 = vld [vmem:[%s4966_s5 + $0x8] sm:$0xff] }
 0x161   :  { %187 = vadd.xlane.f32.xlu1 %v186_v38  ;;  %v183_v39 = vsel %vm182_vm3, %v180_v37, 0.0  ;;  %v4158_v38 = vpack.c.bf16 %v237_v35, %v236_v34 }
 0x162   :  { %184 = vadd.xlane.f32.xlu0 %v183_v39 }
 0x1ee   :  { %v188_v40 = vpop.xlane.xlu1 %187 }
 0x1ef   :  { %v191_v41 = vmul.f32 0.03125, %v188_v40  ;;  %v185_v42 = vpop.xlane.xlu0 %184  ;;  %v242_v40 = vld [vmem:[%s4965_s4 + $0xa0] sm:$0xff] }
 0x1f0   :  { %v190_v43 = vmul.f32 0.03125, %v185_v42  ;;  %v254_v42 = vld [vmem:[%s4965_s4 + $0x100] sm:$0xff] }
 0x1f1   :  { %v193_v44 = vsub.f32 %v181_v36, %v191_v41  ;;  %v248_v36 = vld [vmem:[%s4965_s4 + $0xd0] sm:$0xff]  ;;  %v243_v41 = vld [vmem:[%s4965_s4 + $0xa8] sm:$0xff] }
 0x1f2   :  { %v192_v45 = vsub.f32 %v180_v37, %v190_v43  ;;  %v249_v37 = vld [vmem:[%s4965_s4 + $0xd8] sm:$0xff]  ;;  %v255_v43 = vld [vmem:[%s4965_s4 + $0x108] sm:$0xff] }
 0x1f3   :  { %v195_v48 = vmul.f32 %v193_v44, %v193_v44  ;;  %v4182_v39 = vpack.c.bf16 %v249_v37, %v248_v36  ;;  %v281_v36 = vld [vmem:[%s4966_s5 + $0x58] sm:$0xff]  ;;  %v280_v37 = vld [vmem:[%s4966_s5 + $0x50] sm:$0xff] }
 0x1f4   :  { %v194_v46 = vmul.f32 %v192_v45, %v192_v45 }
 0x1f5   :  { %v199_v49 = vsel %vm182_vm3, %v195_v48, 0.0  ;;  %v256_v48 = vld [vmem:[%s4965_s4 + $0x110] sm:$0xff] }
 0x1f6   :  { %v196_v47 = vsel %vm182_vm3, %v194_v46, 0.0  ;;  %v244_v46 = vld [vmem:[%s4965_s4 + $0xb0] sm:$0xff] }
 0x1f7   :  { %197 = vadd.xlane.f32.xlu0 %v196_v47  ;;  %v245_v47 = vld [vmem:[%s4965_s4 + $0xb8] sm:$0xff] }
 0x1f8   :  { %v4174_v50 = vpack.c.bf16 %v245_v47, %v244_v46  ;;  %v282_v47 = vld [vmem:[%s4966_s5 + $0x60] sm:$0xff] }
 0x1fb   :  { %200 = vadd.xlane.f32.xlu0 %v199_v49  ;;  %v257_v49 = vld [vmem:[%s4965_s4 + $0x118] sm:$0xff] }
 0x1fc   :  { %v4198_v53 = vpack.c.bf16 %v257_v49, %v256_v48  ;;  %v275_v49 = vld [vmem:[%s4966_s5 + $0x28] sm:$0xff] }
 0x284   :  { %v198_v4 = vpop.xlane.xlu0 %197 }
 0x285   :  { %v202_v5 = vmul.f32 0.03125, %v198_v4  ;;  %v261_v4 = vld [vmem:[%s4965_s4 + $0x138] sm:$0xff] }
 0x287   :  { %v204_v6 = vadd.f32 1e-12, %v202_v5 }
 0x288   :  { %v201_v7 = vpop.xlane.xlu0 %200 }
 0x289   :  { %4265 = vrsqrt.f32 %v204_v6  ;;  %v203_v8 = vmul.f32 0.03125, %v201_v7  ;;  %v266_v6 = vld [vmem:[%s4965_s4 + $0x160] sm:$0xff]  ;;  %v267_v7 = vld [vmem:[%s4965_s4 + $0x168] sm:$0xff] }
 0x28b   :  { %v205_v9 = vadd.f32 1e-12, %v203_v8  ;;  %v4218_v8 = vpack.c.bf16 %v267_v7, %v266_v6 }
 0x28d   :  { %4267 = vrsqrt.f32 %v205_v9  ;;  %v268_v9 = vld [vmem:[%s4965_s4 + $0x170] sm:$0xff] }
 0x293   :  { %v4266_v10 = vpop.eup %4265 }
 0x294   :  { %v208_v12 = vmul.f32 %v4266_v10, %v192_v45  ;;  %v4194_v45 = vpack.c.bf16 %v255_v43, %v254_v42  ;;  %v269_v10 = vld [vmem:[%s4965_s4 + $0x178] sm:$0xff]  ;;  %v272_v43 = vld [vmem:[%s4966_s5 + $0x10] sm:$0xff] }
 0x296   :  { %v214_v14 = vmul.f32 %v3572_v11, %v208_v12 }
 0x297   :  { %v4268_v15 = vpop.eup %4267 }
 0x298   :  { %v4449_v16 = vadd.f32 %v3573_v13, %v214_v14  ;;  %v209_v17 = vmul.f32 %v4268_v15, %v193_v44  ;;  %v4170_v44 = vpack.c.bf16 %v243_v41, %v242_v40 }
 0x29a   :  { %v215_v20 = vmul.f32 %v3572_v11, %v209_v17  ;;  %3826 = vmatprep.mubr.msk.f32.mxu1 %vm182_vm3, %v4449_v16  ;;  %3848 = vmatprep.mubr.msk.f32.mxu0 %vm182_vm3, %v4449_v16  ;;  %v4222_v11 = vpack.c.bf16 %v269_v10, %v268_v9  ;;  %v278_v17 = vld [vmem:[%s4966_s5 + $0x40] sm:$0xff] }
 0x29c   :  { %v4467_v25 = vadd.f32 %v3573_v13, %v215_v20 }
 0x29e   :  { %3827 = vmatmul.mubr.msk.f32.vlgmr.msra.gmra.mrb[0].mxu1 %vm182_vm3, %v4467_v25  ;;  %3849 = vmatmul.mubr.msk.f32.vlgmr.msra.gmra.mrb[2].mxu0 %vm182_vm3, %v4467_v25 }
 0x29f   :  { %4141 = vmatpush3.bf16.msra.mxu1 %v4138_v1  ;;  %4165 = vmatpush3.bf16.msra.mxu0 %v4162_v3  ;;  %v4214_v1 = vpack.c.bf16 %v265_v61, %v264_v60  ;;  %v260_v3 = vld [vmem:[%s4965_s4 + $0x130] sm:$0xff] }
 0x2a0   :  { %3837 = vmatprep.mubr.msk.f32.mxu1 %vm182_vm3, %v4449_v16  ;;  %3870 = vmatprep.mubr.msk.f32.mxu0 %vm182_vm3, %v4449_v16  ;;  %v4206_v5 = vpack.c.bf16 %v261_v4, %v260_v3  ;;  %v286_v3 = vld [vmem:[%s4966_s5 + $0x80] sm:$0xff] }
 0x2a1   :  { %4143 = vmatprep.subr.bf16.mxu1 %v4142_v27  ;;  %4167 = vmatprep.subr.bf16.mxu0 %v4166_v28 }
 0x2a3   :  { %4145 = vmatpush3.bf16.msra.mxu1 %v4142_v27  ;;  %4169 = vmatpush3.bf16.msra.mxu0 %v4166_v28  ;;  %v279_v27 = vld [vmem:[%s4966_s5 + $0x48] sm:$0xff] }
 0x2a4   :  { %4155 = vmatprep.subr.bf16.mxu1 %v4154_v32  ;;  %4179 = vmatprep.subr.bf16.mxu0 %v4178_v33 }
 0x2a6   :  { %3838 = vmatmul.mubr.msk.f32.vlgmr.msra.gmra.mrb[2].mxu1 %vm182_vm3, %v4467_v25  ;;  %3871 = vmatmul.mubr.msk.f32.vlgmr.msra.gmra.mrb[4].mxu0 %vm182_vm3, %v4467_v25 }
 0x2a7   :  { %4157 = vmatpush3.bf16.msra.mxu1 %v4154_v32  ;;  %3859 = vmatprep.mubr.msk.f32.mxu1 %vm182_vm3, %v4449_v16 }
 0x2a8   :  { %4181 = vmatpush3.bf16.msra.mxu0 %v4178_v33  ;;  %3892 = vmatprep.mubr.msk.f32.mxu0 %vm182_vm3, %v4449_v16 }
 0x2a9   :  { %4159 = vmatprep.subr.bf16.mxu1 %v4158_v38  ;;  %4183 = vmatprep.subr.bf16.mxu0 %v4182_v39 }
 0x2ab   :  { %4161 = vmatpush3.bf16.msra.mxu1 %v4158_v38 }
 0x2ac   :  { %4185 = vmatpush3.bf16.msra.mxu0 %v4182_v39  ;;  %4171 = vmatprep.subr.bf16.mxu1 %v4170_v44  ;;  %v273_v39 = vld [vmem:[%s4966_s5 + $0x18] sm:$0xff] }
 0x2ad   :  { %4195 = vmatprep.subr.bf16.mxu0 %v4194_v45 }
 0x2ae   :  { %3860 = vmatmul.mubr.msk.f32.vlgmr.msra.gmra.mrb[4].mxu1 %vm182_vm3, %v4467_v25 }
 0x2af   :  { %3893 = vmatmul.mubr.msk.f32.vlgmr.msra.gmra.mrb[6].mxu0 %vm182_vm3, %v4467_v25  ;;  %4173 = vmatpush3.bf16.msra.mxu1 %v4170_v44  ;;  %v283_v44 = vld [vmem:[%s4966_s5 + $0x68] sm:$0xff] }
 0x2b0   :  { %3881 = vmatprep.mubr.msk.f32.mxu1 %vm182_vm3, %v4449_v16  ;;  %4197 = vmatpush3.bf16.msra.mxu0 %v4194_v45 }
 0x2b1   :  { %3914 = vmatprep.mubr.msk.f32.mxu0 %vm182_vm3, %v4449_v16  ;;  %4175 = vmatprep.subr.bf16.mxu1 %v4174_v50 }
 0x2b2   :  { %4199 = vmatprep.subr.bf16.mxu0 %v4198_v53 }
 0x2b3   :  { %4177 = vmatpush3.bf16.msra.mxu1 %v4174_v50 }
 0x2b4   :  { %4201 = vmatpush3.bf16.msra.mxu0 %v4198_v53  ;;  %4187 = vmatprep.subr.bf16.mxu1 %v4186_v56 }
 0x2b5   :  { %4211 = vmatprep.subr.bf16.mxu0 %v4210_v57 }
 0x2b6   :  { %3882 = vmatmul.mubr.msk.f32.vlgmr.msra.gmra.mrb[6].mxu1 %vm182_vm3, %v4467_v25 }
 0x2b7   :  { %3915 = vmatmul.mubr.msk.f32.vlgmr.msra.gmra.mrb[8].mxu0 %vm182_vm3, %v4467_v25  ;;  %4189 = vmatpush3.bf16.msra.mxu1 %v4186_v56 }
 0x2b8   :  { %3903 = vmatprep.mubr.msk.f32.mxu1 %vm182_vm3, %v4449_v16  ;;  %4213 = vmatpush3.bf16.msra.mxu0 %v4210_v57 }
 0x2b9   :  { %3936 = vmatprep.mubr.msk.f32.mxu0 %vm182_vm3, %v4449_v16  ;;  %4191 = vmatprep.subr.bf16.mxu1 %v4190_v62 }
 0x2ba   :  { %4215 = vmatprep.subr.bf16.mxu0 %v4214_v1 }
 0x2bb   :  { %4193 = vmatpush3.bf16.msra.mxu1 %v4190_v62 }
 0x2bc   :  { %4217 = vmatpush3.bf16.msra.mxu0 %v4214_v1  ;;  %4203 = vmatprep.subr.bf16.mxu1 %v4202_v2 }
 0x2bd   :  { %3960 = vmatprep.subr.mxu0 %v4319_v21 }
 0x2be   :  { %3904 = vmatmul.mubr.msk.f32.vlgmr.msra.gmra.mrb[8].mxu1 %vm182_vm3, %v4467_v25 }
 0x2bf   :  { %3937 = vmatmul.mubr.msk.f32.vlgmr.msra.gmra.mrb[10].mxu0 %vm182_vm3, %v4467_v25  ;;  %4205 = vmatpush3.bf16.msra.mxu1 %v4202_v2 }
 0x2c0   :  { %3925 = vmatprep.mubr.msk.f32.mxu1 %vm182_vm3, %v4449_v16  ;;  %4207 = vmatprep.subr.bf16.mxu1 %v4206_v5 }
 0x2c1   :  { %3962 = vmatprep.mubr.msk.f32.mxu0 %vm4320_vm4, %v4319_v21 }
 0x2c3   :  { %4209 = vmatpush3.bf16.msra.mxu1 %v4206_v5 }
 0x2c4   :  { %4219 = vmatprep.subr.bf16.mxu1 %v4218_v8 }
 0x2c6   :  { %3926 = vmatmul.mubr.msk.f32.vlgmr.msra.gmra.mrb[10].mxu1 %vm182_vm3, %v4467_v25 }
 0x2c7   :  { %4221 = vmatpush3.bf16.msra.mxu1 %v4218_v8  ;;  %3947 = vmatprep.mubr.msk.f32.mxu1 %vm182_vm3, %v4449_v16 }
 0x2c8   :  { %4223 = vmatprep.subr.bf16.mxu1 %v4222_v11 }
 0x2cb   :  { %4225 = vmatpush3.bf16.msra.mxu1 %v4222_v11 }
 0x2cc   :  { %3950 = vmatprep.subr.mxu1 %v4319_v21 }
 0x2ce   :  { %3948 = vmatmul.mubr.msk.f32.vlgmr.msra.gmra.mrb[12].mxu1 %vm182_vm3, %v4467_v25 }
 0x2cf   :  { %3952 = vmatprep.mubr.msk.f32.mxu1 %vm4320_vm4, %v4319_v21 }
 0x371   :  { %v3828_v12 = vpop.f32.mrb[0].mxu1  ;;  %v3850_v13 = vpop.f32.mrb[2].mxu0 }
 0x372   :  { %v366_v14 = vpop.f32.mrb[1].mxu1  ;;  %v516_v15 = vpop.f32.mrb[3].mxu0  ;;  %v372_v32 = vadd.f32 %v3828_v12, %v271_v29  ;;  %v522_v56 = vadd.f32 %v3850_v13, %v275_v49  ;;  %v1200_v12 = vld [vmem:[%s4967_s1] sm:$0x1] }
 0x373   :  { %v367_v28 = vadd.f32 %v366_v14, %v270_v24  ;;  %v517_v58 = vadd.f32 %v516_v15, %v274_v52  ;;  %v1202_v13 = vsub.f32 1.0, %v1200_v12  ;;  %v1826_v14 = vshrl.u32 %v68_v18, 7  ;;  %v1201_v15 = vld [vmem:[%s4967_s1 + $0x1] sm:$0x1] }
 0x379   :  { %v3839_v19 = vpop.f32.mrb[2].mxu1  ;;  %v3872_v20 = vpop.f32.mrb[4].mxu0 }
 0x37a   :  { %v441_v22 = vpop.f32.mrb[3].mxu1  ;;  %v666_v23 = vpop.f32.mrb[5].mxu0  ;;  %v672_v30 = vadd.f32 %v3872_v20, %v279_v27  ;;  %v447_v48 = vadd.f32 %v3839_v19, %v273_v39  ;;  %v1204_v19 = vmul.f32 -10000.0, %v1202_v13  ;;  %v1827_v20 = vsub.s32 0, %v1826_v14 }
 0x37b   :  { %v667_v26 = vadd.f32 %v666_v23, %v278_v17  ;;  %v442_v50 = vadd.f32 %v441_v22, %v272_v43  ;;  %v1203_v17 = vsub.f32 1.0, %v1201_v15 }
 0x37c   :  { %v1828_v23 = vrot.slane %v1204_v19, %v1827_v20 }
 0x37d   :  { %3951 = vmatpush3.xpose.msk.msra.mxu1 %vm1206_vm5, %v667_v26  ;;  %v1205_v22 = vmul.f32 -10000.0, %v1203_v17 }
 0x37e   :  { %3955 = vmatprep.subr.mxu1 %v4319_v21 }
 0x380   :  { %3953 = vmatmul.mubr.msk.f32.vlgmr.msra.gmra.mrb[14].mxu1 %vm1206_vm5, %v367_v28  ;;  %v1832_v28 = vrot.slane %v1205_v22, %v1827_v20 }
 0x381   :  { %v3861_v31 = vpop.f32.mrb[4].mxu1  ;;  %3956 = vmatpush3.xpose.msk.msra.mxu1 %vm1206_vm5, %v672_v30  ;;  %3957 = vmatprep.mubr.msk.f32.mxu1 %vm4320_vm4, %v4319_v21 }
 0x382   :  { %v3894_v33 = vpop.f32.mrb[6].mxu0  ;;  %v591_v34 = vpop.f32.mrb[5].mxu1  ;;  %3965 = vmatprep.subr.mxu1 %v4319_v21  ;;  %v597_v4 = vadd.f32 %v3861_v31, %v277_v59 }
 0x383   :  { %v816_v35 = vpop.f32.mrb[7].mxu0  ;;  %v822_v51 = vadd.f32 %v3894_v33, %v283_v44  ;;  %v592_v5 = vadd.f32 %v591_v34, %v276_v63 }
 0x384   :  { %3958 = vmatmul.mubr.msk.f32.vlgmr.msra.gmra.mrb[16].mxu1 %vm1206_vm5, %v372_v32  ;;  %v817_v53 = vadd.f32 %v816_v35, %v282_v47 }
 0x385   :  { %3967 = vmatprep.mubr.msk.f32.mxu1 %vm4320_vm4, %v4319_v21 }
 0x389   :  { %v3883_v38 = vpop.f32.mrb[6].mxu1 }
 0x38a   :  { %v747_v40 = vadd.f32 %v3883_v38, %v281_v36  ;;  %v3916_v41 = vpop.f32.mrb[8].mxu0  ;;  %v741_v42 = vpop.f32.mrb[7].mxu1 }
 0x38b   :  { %v742_v45 = vadd.f32 %v741_v42, %v280_v37  ;;  %v966_v46 = vpop.f32.mrb[9].mxu0  ;;  %v972_v6 = vadd.f32 %v3916_v41, %v287_v0 }
 0x38c   :  { %3966 = vmatpush3.xpose.msk.msra.mxu1 %vm1206_vm5, %v747_v40  ;;  %v967_v7 = vadd.f32 %v966_v46, %v286_v3 }
 0x38d   :  { %3961 = vmatpush3.xpose.msk.msra.mxu0 %vm1206_vm5, %v742_v45  ;;  %3975 = vmatprep.subr.mxu1 %v4319_v21 }
 0x38e   :  { %3970 = vmatprep.subr.mxu0 %v4319_v21 }
 0x38f   :  { %3968 = vmatmul.mubr.msk.f32.vlgmr.msra.gmra.mrb[18].mxu1 %vm1206_vm5, %v447_v48 }
 0x390   :  { %3963 = vmatmul.mubr.msk.f32.vlgmr.msra.gmra.mrb[12].mxu0 %vm1206_vm5, %v442_v50  ;;  %3976 = vmatpush3.xpose.msk.msra.mxu1 %vm1206_vm5, %v822_v51 }
 0x391   :  { %v3905_v57 = vpop.f32.mrb[8].mxu1  ;;  %3971 = vmatpush3.xpose.msk.msra.mxu0 %vm1206_vm5, %v817_v53  ;;  %3977 = vmatprep.mubr.msk.f32.mxu1 %vm4320_vm4, %v4319_v21 }
 0x392   :  { %v897_v60 = vadd.f32 %v3905_v57, %v285_v54  ;;  %v4680_v61 = vpop.f32.mrb[10].mxu0  ;;  %v891_v62 = vpop.f32.mrb[9].mxu1  ;;  %3972 = vmatprep.mubr.msk.f32.mxu0 %vm4320_vm4, %v4319_v21  ;;  %3985 = vmatprep.subr.mxu1 %v4319_v21 }
 0x393   :  { %v892_v1 = vadd.f32 %v891_v62, %v284_v55  ;;  %v4691_v2 = vpop.f32.mrb[11].mxu0  ;;  %3978 = vmatmul.mubr.msk.f32.vlgmr.msra.gmra.mrb[20].mxu1 %vm1206_vm5, %v522_v56  ;;  %3980 = vmatprep.subr.mxu0 %v4319_v21 }
 0x394   :  { %3973 = vmatmul.mubr.msk.f32.vlgmr.msra.gmra.mrb[14].mxu0 %vm1206_vm5, %v517_v58  ;;  %3986 = vmatpush3.xpose.msk.msra.mxu1 %vm1206_vm5, %v897_v60 }
 0x395   :  { %3981 = vmatpush3.xpose.msk.msra.mxu0 %vm1206_vm5, %v892_v1  ;;  %3987 = vmatprep.mubr.msk.f32.mxu1 %vm4320_vm4, %v4319_v21 }
 0x396   :  { %3982 = vmatprep.mubr.msk.f32.mxu0 %vm4320_vm4, %v4319_v21  ;;  %3995 = vmatprep.subr.mxu1 %v4319_v21 }
 0x397   :  { %3988 = vmatmul.mubr.msk.f32.vlgmr.msra.gmra.mrb[22].mxu1 %vm1206_vm5, %v597_v4  ;;  %3990 = vmatprep.subr.mxu0 %v4319_v21 }
 0x398   :  { %3983 = vmatmul.mubr.msk.f32.vlgmr.msra.gmra.mrb[16].mxu0 %vm1206_vm5, %v592_v5  ;;  %3996 = vmatpush3.msra.mxu1 %v972_v6 }
 0x399   :  { %v4709_v8 = vpop.f32.mrb[10].mxu1  ;;  %3991 = vmatpush3.msra.mxu0 %v967_v7  ;;  %3992 = vmatprep.mubr.msk.f32.mxu0 %vm4320_vm4, %v4319_v21 }
 0x39a   :  { %v4713_v9 = vpop.f32.mrb[11].mxu1  ;;  %4000 = vmatprep.subr.mxu0 %v4319_v21  ;;  %3997 = vmatprep.mubr.msk.f32.mxu1 %vm4320_vm4, %v4319_v21 }
 0x39b   :  { %4005 = vmatprep.subr.mxu1 %v4319_v21 }
 0x3a1   :  { %v4719_v10 = vpop.f32.mrb[12].mxu1 }
 0x3a2   :  { %v4721_v11 = vpop.f32.mrb[13].mxu1 }
 0x453   :  { %v1279_v24 = vpop.f32.mrb[14].mxu1 }
 0x454   :  { %v1815_v26 = vmul.f32 0.35355338, %v1279_v24  ;;  %v3954_v27 = vpop.f32.mrb[15].mxu1 }
 0x456   :  { %v1835_v29 = vadd.f32 %v1828_v23, %v1815_v26 }
 0x457   :  { %v1355_v30 = vpop.f32.mrb[16].mxu1 }
 0x458   :  { %v1816_v31 = vmul.f32 0.35355338, %v1355_v30  ;;  %v3959_v32 = vpop.f32.mrb[17].mxu1  ;;  %v1843_v33 = vsel %vm1206_vm5, %v1835_v29, -inf }
 0x459   :  { %1844 = vmax.xlane.f32.xlu1 %v1843_v33 }
 0x45a   :  { %v1836_v18 = vadd.f32 %v1832_v28, %v1816_v31 }
 0x45c   :  { %v1846_v34 = vsel %vm1206_vm5, %v1836_v18, -inf }
 0x45d   :  { %1847 = vmax.xlane.f32.xlu0 %v1846_v34 }
 0x462   :  { %v1507_v35 = vpop.f32.mrb[18].mxu1 }
 0x463   :  { %v1818_v36 = vmul.f32 0.35355338, %v1507_v35  ;;  %v1431_v37 = vpop.f32.mrb[12].mxu0  ;;  %v3969_v38 = vpop.f32.mrb[19].mxu1 }
 0x464   :  { %v1817_v39 = vmul.f32 0.35355338, %v1431_v37  ;;  %v3964_v40 = vpop.f32.mrb[13].mxu0 }
 0x465   :  { %v1838_v41 = vadd.f32 %v1832_v28, %v1818_v36 }
 0x466   :  { %v1659_v42 = vpop.f32.mrb[20].mxu1  ;;  %v1837_v43 = vadd.f32 %v1828_v23, %v1817_v39 }
 0x467   :  { %v1820_v44 = vmul.f32 0.35355338, %v1659_v42  ;;  %v1583_v45 = vpop.f32.mrb[14].mxu0  ;;  %v3979_v46 = vpop.f32.mrb[21].mxu1  ;;  %v1852_v47 = vsel %vm1206_vm5, %v1838_v41, -inf }
 0x468   :  { %v1819_v48 = vmul.f32 0.35355338, %v1583_v45  ;;  %v3974_v49 = vpop.f32.mrb[15].mxu0  ;;  %1853 = vmax.xlane.f32.xlu0 %v1852_v47  ;;  %v1849_v50 = vsel %vm1206_vm5, %v1837_v43, -inf }
 0x469   :  { %1850 = vmax.xlane.f32.xlu1 %v1849_v50  ;;  %v1840_v51 = vadd.f32 %v1832_v28, %v1820_v44 }
 0x46a   :  { %v1811_v52 = vpop.f32.mrb[22].mxu1  ;;  %v1839_v53 = vadd.f32 %v1828_v23, %v1819_v48 }
 0x46b   :  { %v1822_v54 = vmul.f32 0.35355338, %v1811_v52  ;;  %v1735_v55 = vpop.f32.mrb[16].mxu0  ;;  %v3989_v56 = vpop.f32.mrb[23].mxu1  ;;  %v1858_v57 = vsel %vm1206_vm5, %v1840_v51, -inf  ;;  %v288_v52 = vld [vmem:[%s4966_s5 + $0x90] sm:$0xff] }
 0x46c   :  { %v1821_v58 = vmul.f32 0.35355338, %v1735_v55  ;;  %v3984_v59 = vpop.f32.mrb[17].mxu0  ;;  %1859 = vmax.xlane.f32.xlu0 %v1858_v57  ;;  %v1855_v60 = vsel %vm1206_vm5, %v1839_v53, -inf  ;;  %v1042_v55 = vadd.f32 %v4713_v9, %v288_v52  ;;  %v289_v56 = vld [vmem:[%s4966_s5 + $0x98] sm:$0xff] }
 0x46d   :  { %1856 = vmax.xlane.f32.xlu1 %v1855_v60  ;;  %v1842_v62 = vadd.f32 %v1832_v28, %v1822_v54 }
 0x46e   :  { %v1841_v63 = vadd.f32 %v1828_v23, %v1821_v58 }
 0x46f   :  { %v1864_v0 = vsel %vm1206_vm5, %v1842_v62, -inf }
 0x470   :  { %1865 = vmax.xlane.f32.xlu0 %v1864_v0  ;;  %v1861_v1 = vsel %vm1206_vm5, %v1841_v63, -inf }
 0x471   :  { %1862 = vmax.xlane.f32.xlu1 %v1861_v1 }
 0x4e6   :  { %v1845_v3 = vpop.xlane.xlu1 %1844 }
 0x4e7   :  { %v1867_v4 = vsub.f32 %v1835_v29, %v1845_v3 }
 0x4e9   :  { %v1875_v5 = vmul.f32 1.442695, %v1867_v4  ;;  %v290_v4 = vld [vmem:[%s4966_s5 + $0xa0] sm:$0xff] }
 0x4ea   :  { %v1848_v6 = vpop.xlane.xlu0 %1847 }
 0x4eb   :  { %4269 = vpow2.f32 %v1875_v5  ;;  %v1868_v7 = vsub.f32 %v1836_v18, %v1848_v6 }
 0x4ed   :  { %v1877_v12 = vmul.f32 1.442695, %v1868_v7 }
 0x4ef   :  { %4271 = vpow2.f32 %v1877_v12 }
 0x4f5   :  { %v4270_v13 = vpop.eup %4269  ;;  %v1854_v14 = vpop.xlane.xlu0 %1853 }
 0x4f6   :  { %v1870_v15 = vsub.f32 %v1838_v41, %v1854_v14  ;;  %v1851_v17 = vpop.xlane.xlu1 %1850  ;;  %v1891_v19 = vsel %vm1206_vm5, %v4270_v13, 0.0  ;;  %v293_v14 = vld [vmem:[%s4966_s5 + $0xb8] sm:$0xff] }
 0x4f7   :  { %v1869_v20 = vsub.f32 %v1837_v43, %v1851_v17  ;;  %1892 = vadd.xlane.f32.xlu1 %v1891_v19  ;;  %v292_v17 = vld [vmem:[%s4966_s5 + $0xb0] sm:$0xff] }
 0x4f8   :  { %v1881_v22 = vmul.f32 1.442695, %v1870_v15 }
 0x4f9   :  { %v4272_v23 = vpop.eup %4271  ;;  %v1879_v24 = vmul.f32 1.442695, %v1869_v20  ;;  %v1860_v26 = vpop.xlane.xlu0 %1859 }
 0x4fa   :  { %4273 = vpow2.f32 %v1881_v22  ;;  %v1872_v27 = vsub.f32 %v1840_v51, %v1860_v26  ;;  %v1857_v28 = vpop.xlane.xlu1 %1856  ;;  %v1894_v29 = vsel %vm1206_vm5, %v4272_v23, 0.0  ;;  %v1192_v22 = vadd.f32 %v4721_v11, %v292_v17  ;;  %v2515_v11 = vld [vmem:[%s4968_s6] sm:$0xff] }
 0x4fb   :  { %4275 = vpow2.f32 %v1879_v24  ;;  %v1871_v30 = vsub.f32 %v1839_v53, %v1857_v28  ;;  %1895 = vadd.xlane.f32.xlu0 %v1894_v29  ;;  %v2517_v28 = vld [vmem:[%s4968_s6 + $0x10] sm:$0xff] }
 0x4fc   :  { %v1885_v31 = vmul.f32 1.442695, %v1872_v27  ;;  %v2516_v27 = vld [vmem:[%s4968_s6 + $0x8] sm:$0xff] }
 0x4fd   :  { %v1883_v32 = vmul.f32 1.442695, %v1871_v30  ;;  %v1866_v33 = vpop.xlane.xlu0 %1865 }
 0x4fe   :  { %4277 = vpow2.f32 %v1885_v31  ;;  %v1874_v18 = vsub.f32 %v1842_v62, %v1866_v33  ;;  %v1863_v34 = vpop.xlane.xlu1 %1862  ;;  %v1047_v62 = vadd.f32 %v4709_v8, %v289_v56  ;;  %v291_v8 = vld [vmem:[%s4966_s5 + $0xa8] sm:$0xff]  ;;  %v2518_v31 = vld [vmem:[%s4968_s6 + $0x18] sm:$0xff] }
 0x4ff   :  { %4279 = vpow2.f32 %v1883_v32  ;;  %v1873_v35 = vsub.f32 %v1841_v63, %v1863_v34  ;;  %v1122_v7 = vadd.f32 %v4680_v61, %v291_v8  ;;  %v1197_v61 = vadd.f32 %v4719_v10, %v293_v14 }
 0x500   :  { %v1889_v36 = vmul.f32 1.442695, %v1874_v18  ;;  %v2520_v18 = vld [vmem:[%s4968_s6 + $0x28] sm:$0xff] }
 0x501   :  { %v1887_v37 = vmul.f32 1.442695, %v1873_v35  ;;  %v2519_v35 = vld [vmem:[%s4968_s6 + $0x20] sm:$0xff] }
 0x502   :  { %4281 = vpow2.f32 %v1889_v36 }
 0x503   :  { %4283 = vpow2.f32 %v1887_v37 }
 0x504   :  { %v4274_v38 = vpop.eup %4273 }
 0x505   :  { %v4276_v39 = vpop.eup %4275  ;;  %v1900_v40 = vsel %vm1206_vm5, %v4274_v38, 0.0 }
 0x506   :  { %1901 = vadd.xlane.f32.xlu0 %v1900_v40  ;;  %v1897_v41 = vsel %vm1206_vm5, %v4276_v39, 0.0 }
 0x507   :  { %1898 = vadd.xlane.f32.xlu1 %v1897_v41  ;;  %v2521_v41 = vld [vmem:[%s4968_s6 + $0x30] sm:$0xff] }
 0x508   :  { %v4278_v42 = vpop.eup %4277 }
 0x509   :  { %v4280_v43 = vpop.eup %4279  ;;  %v1906_v44 = vsel %vm1206_vm5, %v4278_v42, 0.0 }
 0x50a   :  { %1907 = vadd.xlane.f32.xlu0 %v1906_v44  ;;  %v1903_v45 = vsel %vm1206_vm5, %v4280_v43, 0.0 }
 0x50b   :  { %1904 = vadd.xlane.f32.xlu1 %v1903_v45 }
 0x50c   :  { %v4744_v46 = vpop.eup %4281 }
 0x50d   :  { %v4746_v47 = vpop.eup %4283  ;;  %v1912_v48 = vsel %vm1206_vm5, %v4744_v46, 0.0 }
 0x50e   :  { %1913 = vadd.xlane.f32.xlu0 %v1912_v48  ;;  %v1909_v49 = vsel %vm1206_vm5, %v4746_v47, 0.0 }
 0x50f   :  { %1910 = vadd.xlane.f32.xlu1 %v1909_v49 }
 0x584   :  { %v1893_v50 = vpop.xlane.xlu1 %1892 }
 0x585   :  { %4285 = vrcp.f32 %v1893_v50 }
 0x588   :  { %v1896_v51 = vpop.xlane.xlu0 %1895 }
 0x589   :  { %4287 = vrcp.f32 %v1896_v51 }
 0x58f   :  { %v4286_v53 = vpop.eup %4285 }
 0x590   :  { %v1923_v54 = vmul.f32 %v4286_v53, %v4270_v13  ;;  %v1117_v13 = vadd.f32 %v4691_v2, %v290_v4 }
 0x592   :  { %3993 = vmatmul.mubr.msk.f32.vlgmr.msra.gmra.mrb[18].mxu0 %vm1206_vm5, %v1923_v54 }
 0x593   :  { %v4288_v57 = vpop.eup %4287  ;;  %4001 = vmatpush3.msra.mxu0 %v1042_v55  ;;  %v1902_v58 = vpop.xlane.xlu0 %1901  ;;  %4002 = vmatprep.mubr.msk.f32.mxu0 %vm4320_vm4, %v4319_v21 }
 0x594   :  { %v1924_v59 = vmul.f32 %v4288_v57, %v4272_v23  ;;  %4289 = vrcp.f32 %v1902_v58  ;;  %v1899_v60 = vpop.xlane.xlu1 %1898  ;;  %4010 = vmatprep.subr.mxu0 %v4319_v21 }
 0x595   :  { %4291 = vrcp.f32 %v1899_v60 }
 0x596   :  { %3998 = vmatmul.mubr.msk.f32.vlgmr.msra.gmra.mrb[24].mxu1 %vm1206_vm5, %v1924_v59 }
 0x597   :  { %4006 = vmatpush3.msra.mxu1 %v1047_v62  ;;  %v1908_v9 = vpop.xlane.xlu0 %1907  ;;  %4007 = vmatprep.mubr.msk.f32.mxu1 %vm4320_vm4, %v4319_v21 }
 0x598   :  { %4293 = vrcp.f32 %v1908_v9  ;;  %v1905_v63 = vpop.xlane.xlu1 %1904  ;;  %4015 = vmatprep.subr.mxu1 %v4319_v21 }
 0x599   :  { %4295 = vrcp.f32 %v1905_v63 }
 0x59b   :  { %v1914_v0 = vpop.xlane.xlu0 %1913 }
 0x59c   :  { %4297 = vrcp.f32 %v1914_v0  ;;  %v1911_v1 = vpop.xlane.xlu1 %1910 }
 0x59d   :  { %4299 = vrcp.f32 %v1911_v1 }
 0x59e   :  { %v4290_v3 = vpop.eup %4289 }
 0x59f   :  { %v4292_v5 = vpop.eup %4291  ;;  %v1926_v6 = vmul.f32 %v4290_v3, %v4274_v38 }
 0x5a0   :  { %v1925_v12 = vmul.f32 %v4292_v5, %v4276_v39  ;;  %v2522_v39 = vld [vmem:[%s4968_s6 + $0x38] sm:$0xff] }
 0x5a1   :  { %4008 = vmatmul.mubr.msk.f32.vlgmr.msra.gmra.mrb[26].mxu1 %vm1206_vm5, %v1926_v6 }
 0x5a2   :  { %v4294_v15 = vpop.eup %4293  ;;  %4016 = vmatpush3.msra.mxu1 %v1122_v7  ;;  %4003 = vmatmul.mubr.msk.f32.vlgmr.msra.gmra.mrb[20].mxu0 %vm1206_vm5, %v1925_v12  ;;  %v3630_v7 = vld [vmem:[%s4964_s2 + $0x73] ss:$0 sm:$0xff] }
 0x5a3   :  { %v4296_v19 = vpop.eup %4295  ;;  %v1928_v20 = vmul.f32 %v4294_v15, %v4278_v42  ;;  %4011 = vmatpush3.msra.mxu0 %v1117_v13  ;;  %4017 = vmatprep.mubr.msk.f32.mxu1 %vm4320_vm4, %v4319_v21 }
 0x5a4   :  { %v1927_v2 = vmul.f32 %v4296_v19, %v4280_v43  ;;  %4025 = vmatprep.subr.mxu1 %v4319_v21  ;;  %4012 = vmatprep.mubr.msk.f32.mxu0 %vm4320_vm4, %v4319_v21 }
 0x5a5   :  { %4018 = vmatmul.mubr.msk.f32.vlgmr.msra.gmra.mrb[28].mxu1 %vm1206_vm5, %v1928_v20  ;;  %4020 = vmatprep.subr.mxu0 %v4319_v21 }
 0x5a6   :  { %v4298_v23 = vpop.eup %4297  ;;  %4026 = vmatpush3.msra.mxu1 %v1197_v61  ;;  %4013 = vmatmul.mubr.msk.f32.vlgmr.msra.gmra.mrb[22].mxu0 %vm1206_vm5, %v1927_v2 }
 0x5a7   :  { %v4300_v24 = vpop.eup %4299  ;;  %v1930_v26 = vmul.f32 %v4298_v23, %v4744_v46  ;;  %4021 = vmatpush3.msra.mxu0 %v1192_v22  ;;  %4027 = vmatprep.mubr.msk.f32.mxu1 %vm4320_vm4, %v4319_v21 }
 0x5a8   :  { %v1929_v10 = vmul.f32 %v4300_v24, %v4746_v47  ;;  %4022 = vmatprep.mubr.msk.f32.mxu0 %vm4320_vm4, %v4319_v21  ;;  %4030 = vmatprep.subr.mxu0 %v4319_v21 }
 0x5a9   :  { %4028 = vmatmul.mubr.msk.f32.vlgmr.msra.gmra.mrb[30].mxu1 %vm1206_vm5, %v1930_v26  ;;  %4035 = vmatprep.subr.mxu1 %v4319_v21 }
 0x5aa   :  { %4023 = vmatmul.mubr.msk.f32.vlgmr.msra.gmra.mrb[24].mxu0 %vm1206_vm5, %v1929_v10  ;;  %4037 = vmatprep.mubr.msk.f32.mxu1 %vm4320_vm4, %v4319_v21 }
 0x5ab   :  { %4032 = vmatprep.mubr.msk.f32.mxu0 %vm4320_vm4, %v4319_v21  ;;  %4031 = vmatpush3.msra.mxu0 %v2515_v11 }
 0x5ac   :  { %4040 = vmatprep.subr.mxu0 %v4319_v21  ;;  %4036 = vmatpush3.msra.mxu1 %v2516_v27 }
 0x5ad   :  { %4045 = vmatprep.subr.mxu1 %v4319_v21 }
 0x665   :  { %v2000_v29 = vpop.f32.mrb[18].mxu0 }
 0x666   :  { %v3994_v30 = vpop.f32.mrb[19].mxu0  ;;  %4033 = vmatmul.mubr.msk.f32.vlgmr.msra.gmra.mrb[26].mxu0 %vm1206_vm5, %v2000_v29 }
 0x667   :  { %4041 = vmatpush3.msra.mxu0 %v2517_v28  ;;  %4042 = vmatprep.mubr.msk.f32.mxu0 %vm4320_vm4, %v4319_v21 }
 0x668   :  { %4050 = vmatprep.subr.mxu0 %v4319_v21 }
 0x669   :  { %v2073_v32 = vpop.f32.mrb[24].mxu1 }
 0x66a   :  { %v3999_v33 = vpop.f32.mrb[25].mxu1  ;;  %4038 = vmatmul.mubr.msk.f32.vlgmr.msra.gmra.mrb[32].mxu1 %vm1206_vm5, %v2073_v32 }
 0x66b   :  { %4046 = vmatpush3.msra.mxu1 %v2518_v31  ;;  %4047 = vmatprep.mubr.msk.f32.mxu1 %vm4320_vm4, %v4319_v21 }
 0x66c   :  { %4055 = vmatprep.subr.mxu1 %v4319_v21 }
 0x674   :  { %v2219_v34 = vpop.f32.mrb[26].mxu1 }
 0x675   :  { %v2146_v36 = vpop.f32.mrb[20].mxu0  ;;  %v4009_v37 = vpop.f32.mrb[27].mxu1  ;;  %4048 = vmatmul.mubr.msk.f32.vlgmr.msra.gmra.mrb[34].mxu1 %vm1206_vm5, %v2219_v34 }
 0x676   :  { %v4004_v38 = vpop.f32.mrb[21].mxu0  ;;  %4043 = vmatmul.mubr.msk.f32.vlgmr.msra.gmra.mrb[28].mxu0 %vm1206_vm5, %v2146_v36  ;;  %4056 = vmatpush3.msra.mxu1 %v2520_v18  ;;  %v51_v18 = vld [vmem:[%s4969_s3 + $0x8] sm:$0xff]  ;;  %v53_v36 = vld [vmem:[%s4969_s3 + $0x18] sm:$0xff] }
 0x677   :  { %4051 = vmatpush3.msra.mxu0 %v2519_v35  ;;  %4057 = vmatprep.mubr.msk.f32.mxu1 %vm4320_vm4, %v4319_v21  ;;  %v52_v35 = vld [vmem:[%s4969_s3 + $0x10] sm:$0xff] }
 0x678   :  { %v2365_v40 = vpop.f32.mrb[28].mxu1  ;;  %4052 = vmatprep.mubr.msk.f32.mxu0 %vm4320_vm4, %v4319_v21  ;;  %4060 = vmatprep.subr.mxu0 %v4319_v21  ;;  %v4230_v37 = vpack.c.bf16 %v53_v36, %v52_v35 }
 0x679   :  { %v2292_v42 = vpop.f32.mrb[22].mxu0  ;;  %v4019_v43 = vpop.f32.mrb[29].mxu1  ;;  %4058 = vmatmul.mubr.msk.f32.vlgmr.msra.gmra.mrb[36].mxu1 %vm1206_vm5, %v2365_v40  ;;  %4065 = vmatprep.subr.mxu1 %v4319_v21 }
 0x67a   :  { %v4014_v44 = vpop.f32.mrb[23].mxu0  ;;  %4053 = vmatmul.mubr.msk.f32.vlgmr.msra.gmra.mrb[30].mxu0 %vm1206_vm5, %v2292_v42  ;;  %4066 = vmatpush3.msra.mxu1 %v2522_v39 }
 0x67b   :  { %4061 = vmatpush3.msra.mxu0 %v2521_v41  ;;  %4067 = vmatprep.mubr.msk.f32.mxu1 %vm4320_vm4, %v4319_v21 }
 0x67c   :  { %v2511_v45 = vpop.f32.mrb[30].mxu1  ;;  %4062 = vmatprep.mubr.msk.f32.mxu0 %vm4320_vm4, %v4319_v21 }
 0x67d   :  { %v2438_v46 = vpop.f32.mrb[24].mxu0  ;;  %v4029_v47 = vpop.f32.mrb[31].mxu1  ;;  %4068 = vmatmul.mubr.msk.f32.vlgmr.msra.gmra.mrb[38].mxu1 %vm1206_vm5, %v2511_v45  ;;  %v3631_v45 = vld [vmem:[%s4964_s2 + $0x74] ss:$0 sm:$0xff] }
 0x67e   :  { %v4024_v48 = vpop.f32.mrb[25].mxu0  ;;  %4063 = vmatmul.mubr.msk.f32.vlgmr.msra.gmra.mrb[32].mxu0 %vm1206_vm5, %v2438_v46 }
 0x739   :  { %v2592_v49 = vpop.f32.mrb[26].mxu0 }
 0x73a   :  { %v4034_v50 = vpop.f32.mrb[27].mxu0  ;;  %v3107_v21 = vsel %vm182_vm3, %v2592_v49, 0.0  ;;  %v3632_v49 = vld [vmem:[%s4964_s2 + $0x75] ss:$0 sm:$0xff] }
 0x73d   :  { %v2665_v51 = vpop.f32.mrb[32].mxu1 }
 0x73e   :  { %v4039_v52 = vpop.f32.mrb[33].mxu1  ;;  %v3114_v54 = vsel %vm182_vm3, %v2665_v51, 0.0 }
 0x748   :  { %v2811_v53 = vpop.f32.mrb[34].mxu1 }
 0x749   :  { %v3115_v55 = vsel %vm182_vm3, %v2811_v53, 0.0  ;;  %v2738_v56 = vpop.f32.mrb[28].mxu0  ;;  %v4049_v57 = vpop.f32.mrb[35].mxu1 }
 0x74a   :  { %v3116_v58 = vadd.f32 %v3115_v55, %v3114_v54  ;;  %v3108_v59 = vsel %vm182_vm3, %v2738_v56, 0.0  ;;  %v4044_v60 = vpop.f32.mrb[29].mxu0  ;;  %v54_v54 = vld [vmem:[%s4969_s3 + $0x20] sm:$0xff]  ;;  %v55_v55 = vld [vmem:[%s4969_s3 + $0x28] sm:$0xff]  ;;  %v56_v56 = vld [vmem:[%s4969_s3 + $0x30] sm:$0xff] }
 0x74b   :  { %v3109_v62 = vadd.f32 %v3108_v59, %v3107_v21  ;;  %v4234_v57 = vpack.c.bf16 %v55_v55, %v54_v54  ;;  %v57_v21 = vld [vmem:[%s4969_s3 + $0x38] sm:$0xff]  ;;  %v3633_v59 = vld [vmem:[%s4969_s3 + $0x60] ss:$0 sm:$0xff] }
 0x74c   :  { %v2957_v9 = vpop.f32.mrb[36].mxu1  ;;  %v3638_v55 = vld [vmem:[%s4964_s2 + $0x78] ss:$0 sm:$0xff] }
 0x74d   :  { %v3117_v63 = vsel %vm182_vm3, %v2957_v9, 0.0  ;;  %v2884_v0 = vpop.f32.mrb[30].mxu0  ;;  %v4059_v1 = vpop.f32.mrb[37].mxu1  ;;  %4235 = vmatprep.subr.bf16.mxu1 %v4234_v57 }
 0x74e   :  { %v3118_v8 = vadd.f32 %v3117_v63, %v3116_v58  ;;  %v3110_v3 = vsel %vm182_vm3, %v2884_v0, 0.0  ;;  %v4054_v4 = vpop.f32.mrb[31].mxu0  ;;  %v4238_v58 = vpack.c.bf16 %v57_v21, %v56_v56  ;;  %4237 = vmatpush3.bf16.xpose.msra.mxu1 %v4234_v57 }
 0x74f   :  { %v3111_v5 = vadd.f32 %v3110_v3, %v3109_v62 }
 0x750   :  { %v3103_v6 = vpop.f32.mrb[38].mxu1  ;;  %4239 = vmatprep.subr.bf16.mxu1 %v4238_v58 }
 0x751   :  { %v3119_v12 = vsel %vm182_vm3, %v3103_v6, 0.0  ;;  %v3030_v13 = vpop.f32.mrb[32].mxu0  ;;  %v4069_v14 = vpop.f32.mrb[39].mxu1 }
 0x752   :  { %v3120_v15 = vadd.f32 %v3119_v12, %v3118_v8  ;;  %v3112_v17 = vsel %vm182_vm3, %v3030_v13, 0.0  ;;  %v4064_v19 = vpop.f32.mrb[33].mxu0 }
 0x753   :  { %v3113_v20 = vadd.f32 %v3112_v17, %v3111_v5 }
 0x754   :  { %v3126_v61 = vadd.f32 %v3630_v7, %v3120_v15 }
 0x755   :  { %v3125_v2 = vadd.f32 %v3630_v7, %v3113_v20 }
 0x756   :  { %v3128_v22 = vadd.f32 %v3126_v61, %v4467_v25  ;;  %4241 = vmatpush3.bf16.xpose.msra.mxu1 %v4238_v58 }
 0x757   :  { %v3127_v23 = vadd.f32 %v3125_v2, %v4449_v16  ;;  %v50_v16 = vld [vmem:[%s4969_s3] sm:$0xff] }
 0x758   :  { %v3132_v24 = vsel %vm182_vm3, %v3128_v22, 0.0  ;;  %v4226_v34 = vpack.c.bf16 %v51_v18, %v50_v16 }
 0x759   :  { %3133 = vadd.xlane.f32.xlu0 %v3132_v24  ;;  %v3129_v26 = vsel %vm182_vm3, %v3127_v23, 0.0 }
 0x75a   :  { %3130 = vadd.xlane.f32.xlu1 %v3129_v26  ;;  %4227 = vmatprep.subr.bf16.mxu0 %v4226_v34 }
 0x75b   :  { %4229 = vmatpush3.bf16.msra.mxu0 %v4226_v34 }
 0x75c   :  { %4231 = vmatprep.subr.bf16.mxu0 %v4230_v37 }
 0x75f   :  { %4233 = vmatpush3.bf16.msra.mxu0 %v4230_v37 }
 0x7e6   :  { %v3134_v10 = vpop.xlane.xlu0 %3133 }
 0x7e7   :  { %v3136_v11 = vmul.f32 0.03125, %v3134_v10  ;;  %v3131_v27 = vpop.xlane.xlu1 %3130 }
 0x7e8   :  { %v3135_v28 = vmul.f32 0.03125, %v3131_v27 }
 0x7e9   :  { %v3138_v29 = vsub.f32 %v3128_v22, %v3136_v11 }
 0x7ea   :  { %v3137_v30 = vsub.f32 %v3127_v23, %v3135_v28  ;;  %v3636_v23 = vld [vmem:[%s4964_s2 + $0x76] ss:$0 sm:$0xff] }
 0x7eb   :  { %v3140_v31 = vmul.f32 %v3138_v29, %v3138_v29 }
 0x7ec   :  { %v3139_v32 = vmul.f32 %v3137_v30, %v3137_v30 }
 0x7ed   :  { %v3144_v33 = vsel %vm182_vm3, %v3140_v31, 0.0 }
 0x7ee   :  { %3145 = vadd.xlane.f32.xlu0 %v3144_v33  ;;  %v3141_v25 = vsel %vm182_vm3, %v3139_v32, 0.0 }
 0x7ef   :  { %3142 = vadd.xlane.f32.xlu1 %v3141_v25 }
 0x87b   :  { %v3146_v38 = vpop.xlane.xlu0 %3145 }
 0x87c   :  { %v3148_v39 = vmul.f32 0.03125, %v3146_v38  ;;  %v3143_v40 = vpop.xlane.xlu1 %3142  ;;  %v34_v38 = vld [vmem:[%s4964_s2 + $0x40] sm:$0xff] }
 0x87d   :  { %v3147_v41 = vmul.f32 0.03125, %v3143_v40 }
 0x87e   :  { %v3150_v42 = vadd.f32 1e-12, %v3148_v39  ;;  %v35_v39 = vld [vmem:[%s4964_s2 + $0x48] sm:$0xff] }
 0x87f   :  { %v3149_v43 = vadd.f32 1e-12, %v3147_v41  ;;  %v4242_v40 = vpack.c.bf16 %v35_v39, %v34_v38  ;;  %v36_v41 = vld [vmem:[%s4964_s2 + $0x50] sm:$0xff] }
 0x880   :  { %4301 = vrsqrt.f32 %v3150_v42  ;;  %v37_v42 = vld [vmem:[%s4964_s2 + $0x58] sm:$0xff] }
 0x881   :  { %4303 = vrsqrt.f32 %v3149_v43  ;;  %v4246_v43 = vpack.c.bf16 %v37_v42, %v36_v41  ;;  %4243 = vmatprep.subr.bf16.mxu0 %v4242_v40 }
 0x88a   :  { %v4302_v44 = vpop.eup %4301 }
 0x88b   :  { %v4304_v46 = vpop.eup %4303  ;;  %v3154_v47 = vmul.f32 %v4302_v44, %v3138_v29 }
 0x88c   :  { %v3153_v48 = vmul.f32 %v4304_v46, %v3137_v30 }
 0x88d   :  { %v3160_v50 = vmul.f32 %v3631_v45, %v3154_v47 }
 0x88e   :  { %v3159_v51 = vmul.f32 %v3631_v45, %v3153_v48 }
 0x88f   :  { %v3166_v53 = vadd.f32 %v3632_v49, %v3160_v50 }
 0x890   :  { %v3165_v52 = vadd.f32 %v3632_v49, %v3159_v51  ;;  %v3637_v51 = vld [vmem:[%s4964_s2 + $0x77] ss:$0 sm:$0xff] }
 0x892   :  { %4078 = vmatprep.mubr.msk.f32.mxu0 %vm182_vm3, %v3165_v52 }
 0x893   :  { %4079 = vmatmul.mubr.msk.f32.vlgmr.msra.gmra.mrb[34].mxu0 %vm182_vm3, %v3166_v53 }
 0x894   :  { %4245 = vmatpush3.bf16.msra.mxu0 %v4242_v40 }
 0x895   :  { %4247 = vmatprep.subr.bf16.mxu0 %v4246_v43 }
 0x898   :  { %4249 = vmatpush3.bf16.msra.mxu0 %v4246_v43 }
 0x966   :  { %v4080_v60 = vpop.f32.mrb[34].mxu0 }
 0x967   :  { %v3249_v62 = vadd.f32 %v4080_v60, %v3633_v59  ;;  %v3243_v9 = vpop.f32.mrb[35].mxu0  ;;  %v59_v60 = vld [vmem:[%s4969_s3 + $0x48] sm:$0xff] }
 0x968   :  { %v3244_v63 = vadd.f32 %v3633_v59, %v3243_v9  ;;  %v58_v59 = vld [vmem:[%s4969_s3 + $0x40] sm:$0xff] }
 0x969   :  { %v3253_v0 = vmul.f32 %v3249_v62, %v3249_v62  ;;  %v4250_v9 = vpack.c.bf16 %v59_v60, %v58_v59 }
 0x96a   :  { %v3252_v1 = vmul.f32 %v3244_v63, %v3244_v63 }
 0x96b   :  { %v3255_v8 = vmul.f32 %v3253_v0, %v3249_v62  ;;  %4251 = vmatprep.subr.bf16.mxu0 %v4250_v9 }
 0x96c   :  { %v3254_v3 = vmul.f32 %v3252_v1, %v3244_v63  ;;  %v3639_v1 = vld [vmem:[%s4964_s2 + $0x79] ss:$0 sm:$0xff] }
 0x96d   :  { %v3257_v4 = vmul.f32 0.044715, %v3255_v8 }
 0x96e   :  { %v3256_v5 = vmul.f32 0.044715, %v3254_v3 }
 0x96f   :  { %v3259_v6 = vadd.f32 %v3257_v4, %v3249_v62 }
 0x970   :  { %v3258_v7 = vadd.f32 %v3256_v5, %v3244_v63 }
 0x971   :  { %v3261_v12 = vmul.f32 0.7978846, %v3259_v6 }
 0x972   :  { %v3260_v13 = vmul.f32 0.7978846, %v3258_v7 }
 0x973   :  { %4305 = vtanh.f32 %v3261_v12  ;;  %v3642_v12 = vld [vmem:[%s4969_s3 + $0x61] ss:$0 sm:$0xff] }
 0x974   :  { %4307 = vtanh.f32 %v3260_v13 }
 0x97d   :  { %v4306_v14 = vpop.eup %4305 }
 0x97e   :  { %v4308_v15 = vpop.eup %4307  ;;  %v3265_v17 = vadd.f32 1.0, %v4306_v14 }
 0x97f   :  { %v3264_v19 = vadd.f32 1.0, %v4308_v15 }
 0x980   :  { %v3267_v20 = vmul.f32 0.5, %v3265_v17 }
 0x981   :  { %v3266_v61 = vmul.f32 0.5, %v3264_v19 }
 0x982   :  { %v3269_v22 = vmul.f32 %v3267_v20, %v3249_v62  ;;  %v60_v62 = vld [vmem:[%s4969_s3 + $0x50] sm:$0xff] }
 0x983   :  { %v3268_v2 = vmul.f32 %v3266_v61, %v3244_v63  ;;  %v61_v63 = vld [vmem:[%s4969_s3 + $0x58] sm:$0xff] }
 0x984   :  { %v4254_v0 = vpack.c.bf16 %v61_v63, %v60_v62 }
 0x985   :  { %4089 = vmatprep.mubr.f32.mxu1 %v3268_v2 }
 0x986   :  { %4090 = vmatmul.mubr.f32.vlgmr.msra.gmra.mrb[40].mxu1 %v3269_v22 }
 0xa59   :  { %v4091_v24 = vpop.f32.mrb[40].mxu1 }
 0xa5a   :  { %v3346_v26 = vadd.f32 %v4091_v24, %v3636_v23  ;;  %v3340_v10 = vpop.f32.mrb[41].mxu1 }
 0xa5b   :  { %v3341_v11 = vadd.f32 %v3636_v23, %v3340_v10 }
 0xa5c   :  { %v3350_v27 = vadd.f32 %v3346_v26, %v3166_v53 }
 0xa5d   :  { %v3349_v28 = vadd.f32 %v3341_v11, %v3165_v52 }
 0xa5e   :  { %v3354_v29 = vsel %vm182_vm3, %v3350_v27, 0.0 }
 0xa5f   :  { %3355 = vadd.xlane.f32.xlu0 %v3354_v29  ;;  %v3351_v30 = vsel %vm182_vm3, %v3349_v28, 0.0 }
 0xa60   :  { %3352 = vadd.xlane.f32.xlu1 %v3351_v30 }
 0xaec   :  { %v3356_v31 = vpop.xlane.xlu0 %3355 }
 0xaed   :  { %v3358_v32 = vmul.f32 0.03125, %v3356_v31  ;;  %v3353_v33 = vpop.xlane.xlu1 %3352 }
 0xaee   :  { %v3357_v25 = vmul.f32 0.03125, %v3353_v33 }
 0xaef   :  { %v3360_v16 = vsub.f32 %v3350_v27, %v3358_v32 }
 0xaf0   :  { %v3359_v18 = vsub.f32 %v3349_v28, %v3357_v25 }
 0xaf1   :  { %v3362_v34 = vmul.f32 %v3360_v16, %v3360_v16 }
 0xaf2   :  { %v3361_v35 = vmul.f32 %v3359_v18, %v3359_v18 }
 0xaf3   :  { %v3366_v36 = vsel %vm182_vm3, %v3362_v34, 0.0 }
 0xaf4   :  { %3367 = vadd.xlane.f32.xlu0 %v3366_v36  ;;  %v3363_v37 = vsel %vm182_vm3, %v3361_v35, 0.0 }
 0xaf5   :  { %3364 = vadd.xlane.f32.xlu1 %v3363_v37 }
 0xb81   :  { %v3368_v44 = vpop.xlane.xlu0 %3367 }
 0xb82   :  { %v3370_v45 = vmul.f32 0.03125, %v3368_v44  ;;  %v3365_v46 = vpop.xlane.xlu1 %3364 }
 0xb83   :  { %v3369_v47 = vmul.f32 0.03125, %v3365_v46 }
 0xb84   :  { %v3372_v48 = vadd.f32 1e-12, %v3370_v45 }
 0xb85   :  { %v3371_v49 = vadd.f32 1e-12, %v3369_v47 }
 0xb86   :  { %4309 = vrsqrt.f32 %v3372_v48 }
 0xb87   :  { %4311 = vrsqrt.f32 %v3371_v49 }
 0xb90   :  { %v4310_v50 = vpop.eup %4309 }
 0xb91   :  { %v4312_v52 = vpop.eup %4311  ;;  %v3376_v53 = vmul.f32 %v4310_v50, %v3360_v16 }
 0xb92   :  { %v3375_v54 = vmul.f32 %v4312_v52, %v3359_v18 }
 0xb93   :  { %v3382_v56 = vmul.f32 %v3637_v51, %v3376_v53 }
 0xb94   :  { %v3381_v57 = vmul.f32 %v3637_v51, %v3375_v54 }
 0xb95   :  { %v3388_v58 = vadd.f32 %v3638_v55, %v3382_v56 }
 0xb96   :  { %v3387_v21 = vadd.f32 %v3638_v55, %v3381_v57 }
 0xb98   :  { %4100 = vmatprep.mubr.msk.f32.mxu0 %vm182_vm3, %v3387_v21 }
 0xb99   :  { %4101 = vmatmul.mubr.msk.f32.vlgmr.msra.gmra.mrb[36].mxu0 %vm182_vm3, %v3388_v58 }
 0xb9a   :  { %4253 = vmatpush3.bf16.msra.mxu0 %v4250_v9 }
 0xb9b   :  { %4255 = vmatprep.subr.bf16.mxu0 %v4254_v0 }
 0xb9e   :  { %4257 = vmatpush3.bf16.msra.mxu0 %v4254_v0 }
 0xc6c   :  { %v4102_v8 = vpop.f32.mrb[36].mxu0 }
 0xc6d   :  { %v3471_v3 = vadd.f32 %v4102_v8, %v3639_v1  ;;  %v3465_v4 = vpop.f32.mrb[37].mxu0 }
 0xc6e   :  { %v3466_v5 = vadd.f32 %v3639_v1, %v3465_v4 }
 0xc70   :  { %4313 = vtanh.f32 %v3466_v5 }
 0xc71   :  { %4315 = vtanh.f32 %v3471_v3 }
 0xc7a   :  { %v4314_v6 = vpop.eup %4313 }
 0xc7b   :  { %v4316_v7 = vpop.eup %4315  ;;  %4111 = vmatprep.mubr.msk.f32.mxu0 %vm182_vm3, %v4314_v6 }
 0xc7c   :  { %4112 = vmatmul.mubr.msk.f32.vlgmr.msra.gmra.mrb[38].mxu0 %vm182_vm3, %v4316_v7 }
 0xd4f   :  { %v4113_v13 = vpop.f32.mrb[38].mxu0 }
 0xd50   :  { %v3558_v14 = vadd.f32 %v4113_v13, %v3642_v12  ;;  %v3552_v15 = vpop.f32.mrb[39].mxu0 }
 0xd51   :  { %v3553_v17 = vadd.f32 %v3642_v12, %v3552_v15 }
 0xd52   :  { %3562 = vst [vmem:[%s4970_s7 + $0x8] sm:$0xff] %v3558_v14 }
 0xd53   :  { %3561 = vst [vmem:[%s4970_s7] sm:$0xff] %v3553_v17 }

</bundles_post_ra>
